<compile_context>
chip_gen: v7x
topology: tpu7x:2x2x1
jax: 0.10.0
libtpu: 0.0.40
codegen_flags: <defaults>
</compile_context>

<pallas_src>
import jax
import jax.numpy as jnp
from jax.experimental import pallas as pl
from jax.experimental.pallas import tpu as pltpu


# Matmul operand dtype.  jnp.float32 == exact PyTorch eval numerics.  Set to
# jnp.bfloat16 on v5e/v6e/v7x for ~2-4x MXU throughput and half the weight
# footprint; gate nonlinearities and the cell state stay f32 regardless, and
# the self-check below widens its tolerance automatically.
MATMUL_DTYPE = jnp.float32

_SUBLANE = 8        # batch padded to one full sublane group
_MAX_TB = 8         # time-block cap: bounds vreg live ranges of the unroll


def _mm(a, b):
    """Matmul with the chip-appropriate operand dtype, f32 accumulation."""
    return jnp.dot(a.astype(MATMUL_DTYPE), b.astype(MATMUL_DTYPE),
                   preferred_element_type=jnp.float32)


# ---------------------------------------------------------------------------
# LSTM recurrence kernel.
#   grid = (B_pad // Bt, T_pad // TB): batch blocks (parallel) x time blocks
#   (arbitrary / recurrence).  PyTorch gate order: i, f, g, o.
#   hn/cn output blocks have a constant time index -> they ARE the h/c carry.
# ---------------------------------------------------------------------------
def _make_lstm_kernel(T, TB, H, Bt):
    # Load the whole gate-input block into vregs only when it is small;
    # otherwise slice per timestep straight from VMEM (bounds live ranges).
    load_whole_block = Bt * TB * 4 * H * 4 <= 64 * 1024   # <= 16 vregs

    def kernel(gx_ref, whh_ref, out_ref, hn_ref, cn_ref):
        t = pl.program_id(1)

        @pl.when(t == 0)
        def _init():
            hn_ref[...] = jnp.zeros_like(hn_ref)
            cn_ref[...] = jnp.zeros_like(cn_ref)

        whh = whh_ref[...].astype(MATMUL_DTYPE)   # cast hoisted out of the loop
        h = hn_ref[...]                           # (Bt, H) carry
        c = cn_ref[...]                           # (Bt, H) carry
        gx_all = gx_ref[...] if load_whole_block else None

        hs = []
        for tt in range(TB):                      # TB <= 8: bounded static unroll
            gxt = gx_all[:, tt, :] if load_whole_block else gx_ref[:, tt, :]
            gates = gxt + jnp.dot(h.astype(MATMUL_DTYPE), whh,
                                  preferred_element_type=jnp.float32)
            i = jax.nn.sigmoid(gates[:, 0 * H:1 * H])
            f = jax.nn.sigmoid(gates[:, 1 * H:2 * H])
            g = jnp.tanh(gates[:, 2 * H:3 * H])
            o = jax.nn.sigmoid(gates[:, 3 * H:4 * H])
            c_new = f * c + i * g
            h_new = o * jnp.tanh(c_new)
            if T % TB != 0:
                # Time axis is zero-padded: freeze the carry on padded steps so
                # hn/cn hold the state after the last REAL timestep.
                valid = (t * TB + tt) < T
                h = jnp.where(valid, h_new, h)
                c = jnp.where(valid, c_new, c)
            else:
                h, c = h_new, c_new
            hs.append(h_new)

        # One dense (Bt, TB, H) store per grid step (no masked per-step stores).
        out_ref[...] = jnp.stack(hs, axis=1).astype(out_ref.dtype)
        hn_ref[...] = h
        cn_ref[...] = c

    return kernel


def encoder_lstm_forward(ids, emb_table, w_ih, w_hh, b_ih, b_hh):
    """ids: (B, T) int token ids.  Weights in PyTorch layout: w_ih (4H, E),
    w_hh (4H, H), biases (4H,), gate order i,f,g,o.
    Returns output (B, T, H) batch_first, hn (1, B, H), cn (1, B, H)."""
    B, T = ids.shape
    V, E = emb_table.shape
    H = w_hh.shape[1]
    assert w_ih.shape == (4 * H, E) and w_hh.shape == (4 * H, H)

    # One-off weight prep (tiny; not an activation transpose).
    wih_t = jnp.transpose(w_ih).astype(jnp.float32)     # (E, 4H)
    whh_t = jnp.transpose(w_hh).astype(jnp.float32)     # (H, 4H)
    bias = (b_ih + b_hh).astype(jnp.float32)            # both biases folded once

    # Embedding + input projection OUTSIDE the kernel (one XLA matmul).
    # Valid because Dropout(0.4) is identity in eval mode.  Token ids are
    # clamped once here (PyTorch's nn.Embedding would raise on OOB ids).
    emb_x = jnp.take(emb_table, ids.astype(jnp.int32), axis=0, mode="clip")
    gx = _mm(emb_x, wih_t) + bias                       # (B, T, 4H) f32

    # Pad batch to a sublane group and time to a multiple of the time block.
    Bt = _SUBLANE
    TB = min(_MAX_TB, T)
    B_pad = pl.cdiv(B, Bt) * Bt
    T_pad = pl.cdiv(T, TB) * TB
    if (B_pad, T_pad) != (B, T):
        gx = jnp.pad(gx, ((0, B_pad - B), (0, T_pad - T), (0, 0)))
    nb, nt = B_pad // Bt, T_pad // TB

    # Explicit VMEM budget: double-buffered gx/out blocks + resident Whh +
    # carries.  Without this the default scoped limit (16/32 MiB) bites long
    # before physical VMEM; clamp at v7x's 64 MiB physical capacity.
    est = 4 * (2 * Bt * TB * 4 * H       # gx blocks (double-buffered)
               + 2 * Bt * TB * H         # out blocks (double-buffered)
               + 2 * H * 4 * H           # Whh (default double-buffered)
               + 4 * Bt * H)             # hn/cn carries
    vmem_limit = int(min(64 * 2 ** 20, max(32 * 2 ** 20, 2 * est)))

    kernel = _make_lstm_kernel(T, TB, H, Bt)

    out, hn, cn = pl.pallas_call(
        kernel,
        grid=(nb, nt),
        in_specs=[
            # Streamed per-(batch, time)-block gate inputs.
            pl.BlockSpec((Bt, TB, 4 * H), lambda b, t: (b, t, 0)),
            # Recurrent weight: constant block index -> VMEM-resident.
            # (On VMEM-tight chips this is where pipeline_mode=pl.Buffered(1)
            #  would halve its footprint; kept at the default here.)
            pl.BlockSpec((H, 4 * H), lambda b, t: (0, 0)),
        ],
        out_specs=(
            pl.BlockSpec((Bt, TB, H), lambda b, t: (b, t, 0)),
            pl.BlockSpec((Bt, H), lambda b, t: (b, 0)),    # hn: resident carry
            pl.BlockSpec((Bt, H), lambda b, t: (b, 0)),    # cn: resident carry
        ),
        out_shape=(
            jax.ShapeDtypeStruct((B_pad, T_pad, H), jnp.float32),
            jax.ShapeDtypeStruct((B_pad, H), jnp.float32),
            jax.ShapeDtypeStruct((B_pad, H), jnp.float32),
        ),
        compiler_params=pltpu.CompilerParams(
            # Batch blocks are independent (megacore-parallel on v7x);
            # the time axis is the recurrence.
            dimension_semantics=("parallel", "arbitrary"),
            vmem_limit_bytes=vmem_limit,
        ),
    )(gx.astype(jnp.float32), whh_t)

    return out[:B, :T], hn[:B][None], cn[:B][None]       # hn/cn: (1, B, H)


# ---------------------------------------------------------------------------
# Encoder.forward
# ---------------------------------------------------------------------------
@jax.jit
def encoder_forward(x, params):
    # Dropout(0.4) in eval mode == identity (this also makes the wrapper-side
    # embedding @ W_ih^T pre-fusion valid).
    return encoder_lstm_forward(
        x,
        params["embedding"],
        params["w_ih"], params["w_hh"], params["b_ih"], params["b_hh"],
    )


def init_params(key, input_dim, hidden_dim, embedding_dim):
    k_emb, k1, k2, k3, k4 = jax.random.split(key, 5)
    bound = 1.0 / jnp.sqrt(hidden_dim)
    return {
        # nn.Embedding default init: N(0, 1)
        "embedding": jax.random.normal(
            k_emb, (input_dim, embedding_dim), jnp.float32
        ),
        # nn.LSTM default init: U(-1/sqrt(H), 1/sqrt(H)); gate order i,f,g,o
        "w_ih": jax.random.uniform(
            k1, (4 * hidden_dim, embedding_dim), jnp.float32, -bound, bound
        ),
        "w_hh": jax.random.uniform(
            k2, (4 * hidden_dim, hidden_dim), jnp.float32, -bound, bound
        ),
        "b_ih": jax.random.uniform(
            k3, (4 * hidden_dim,), jnp.float32, -bound, bound
        ),
        "b_hh": jax.random.uniform(
            k4, (4 * hidden_dim,), jnp.float32, -bound, bound
        ),
    }


# Pure-JAX reference (same math, same matmul dtype) for a correctness check.
def _reference(x, params):
    H = params["w_hh"].shape[1]
    B = x.shape[0]
    wih_t = params["w_ih"].T
    whh_t = params["w_hh"].T
    bias = params["b_ih"] + params["b_hh"]
    emb = jnp.take(params["embedding"], x, axis=0, mode="clip")     # (B, T, E)
    gx = _mm(emb, wih_t) + bias                                     # (B, T, 4H)

    def step(carry, xt):
        h, c = carry
        gates = xt + _mm(h, whh_t)
        i = jax.nn.sigmoid(gates[:, 0 * H:1 * H])
        f = jax.nn.sigmoid(gates[:, 1 * H:2 * H])
        g = jnp.tanh(gates[:, 2 * H:3 * H])
        o = jax.nn.sigmoid(gates[:, 3 * H:4 * H])
        c = f * c + i * g
        h = o * jnp.tanh(c)
        return (h, c), h

    h0 = jnp.zeros((B, H), jnp.float32)
    (hn, cn), outs = jax.lax.scan(step, (h0, h0), jnp.swapaxes(gx, 0, 1))
    return jnp.swapaxes(outs, 0, 1), hn[None], cn[None]


if __name__ == "__main__":
    # Small shapes consistent with the module.
    input_dim = 50       # vocab size
    hidden_dim = 32
    embedding_dim = 32
    B, T = 2, 8

    key = jax.random.PRNGKey(0)
    k_param, k_ids = jax.random.split(key)
    params = init_params(k_param, input_dim, hidden_dim, embedding_dim)
    x = jax.random.randint(k_ids, (B, T), 0, input_dim, dtype=jnp.int32)

    output, hn, cn = encoder_forward(x, params)
    jax.block_until_ready((output, hn, cn))

    ref_out, ref_hn, ref_cn = _reference(x, params)
    tol = 1e-4 if MATMUL_DTYPE == jnp.float32 else 2e-2
    assert output.shape == (B, T, hidden_dim)
    assert hn.shape == (1, B, hidden_dim) and cn.shape == (1, B, hidden_dim)
    assert jnp.allclose(output, ref_out, atol=tol, rtol=tol), "output mismatch"
    assert jnp.allclose(hn, ref_hn, atol=tol, rtol=tol), "hn mismatch"
    assert jnp.allclose(cn, ref_cn, atol=tol, rtol=tol), "cn mismatch"

    print("KERNEL_OK")
</pallas_src>

<mosaic_0001>
module attributes {stable_mosaic.version = 11 : i64} {
  func.func @kernel(%arg0: i32, %arg1: i32, %arg2: memref<8x8x128xf32, #tpu.memory_space<vmem>>, %arg3: memref<32x128xf32, #tpu.memory_space<vmem>>, %arg4: memref<8x8x32xf32, #tpu.memory_space<vmem>>, %arg5: memref<8x32xf32, #tpu.memory_space<vmem>>, %arg6: memref<8x32xf32, #tpu.memory_space<vmem>>) attributes {dimension_semantics = [#tpu.dimension_semantics<parallel>, #tpu.dimension_semantics<arbitrary>], iteration_bounds = array<i64: 1, 1>, scalar_prefetch = 0 : i64, scratch_operands = 0 : i64, tpu.core_type = #tpu.core_type<tc>, window_params = [{transform_indices = @transform_0, window_bounds = array<i64: 8, 8, 128>}, {pipeline_mode = #tpu.pipeline_mode<synchronous>, transform_indices = @transform_1, window_bounds = array<i64: 32, 128>}, {transform_indices = @transform_2, window_bounds = array<i64: 8, 8, 32>}, {transform_indices = @transform_3, window_bounds = array<i64: 8, 32>}, {transform_indices = @transform_4, window_bounds = array<i64: 8, 32>}]} {
    %c0_i32 = arith.constant 0 : i32
    %0 = arith.cmpi eq, %arg1, %c0_i32 : i32
    %1 = arith.extui %0 : i1 to i32
    %c0_i32_0 = arith.constant 0 : i32
    %2 = arith.cmpi ne, %1, %c0_i32_0 : i32
    scf.if %2 {
      %cst_47 = arith.constant 0.000000e+00 : f32
      %251 = vector.broadcast %cst_47 : f32 to vector<8x32xf32>
      %c0_48 = arith.constant 0 : index
      %c0_49 = arith.constant 0 : index
      %252 = vector.load %arg5[%c0_48, %c0_49] : memref<8x32xf32, #tpu.memory_space<vmem>>, vector<8x32xf32>
      tpu.vector_store %arg5[%c0_48, %c0_49], %251 {strides = array<i32>} : memref<8x32xf32, #tpu.memory_space<vmem>>, vector<8x32xf32>,
      %cst_50 = arith.constant 0.000000e+00 : f32
      %253 = vector.broadcast %cst_50 : f32 to vector<8x32xf32>
      %c0_51 = arith.constant 0 : index
      %c0_52 = arith.constant 0 : index
      %254 = vector.load %arg6[%c0_51, %c0_52] : memref<8x32xf32, #tpu.memory_space<vmem>>, vector<8x32xf32>
      tpu.vector_store %arg6[%c0_51, %c0_52], %253 {strides = array<i32>} : memref<8x32xf32, #tpu.memory_space<vmem>>, vector<8x32xf32>,
    } else {
    }
    %c0 = arith.constant 0 : index
    %c0_1 = arith.constant 0 : index
    %3 = vector.load %arg3[%c0, %c0_1] : memref<32x128xf32, #tpu.memory_space<vmem>>, vector<32x128xf32>
    %c0_2 = arith.constant 0 : index
    %c0_3 = arith.constant 0 : index
    %4 = vector.load %arg5[%c0_2, %c0_3] : memref<8x32xf32, #tpu.memory_space<vmem>>, vector<8x32xf32>
    %c0_4 = arith.constant 0 : index
    %c0_5 = arith.constant 0 : index
    %5 = vector.load %arg6[%c0_4, %c0_5] : memref<8x32xf32, #tpu.memory_space<vmem>>, vector<8x32xf32>
    %c0_6 = arith.constant 0 : index
    %c0_7 = arith.constant 0 : index
    %c0_8 = arith.constant 0 : index
    %6 = vector.load %arg2[%c0_6, %c0_7, %c0_8] : memref<8x8x128xf32, #tpu.memory_space<vmem>>, vector<8x8x128xf32>
    %7 = vector.extract_strided_slice %6 {offsets = [0, 0, 0], sizes = [8, 1, 128], strides = [1, 1, 1]} : vector<8x8x128xf32> to vector<8x1x128xf32>
    %8 = vector.shape_cast %7 : vector<8x1x128xf32> to vector<8x128xf32>
    %cst = arith.constant dense<0.000000e+00> : vector<8x128xf32>
    %9 = tpu.matmul %4, %3, %cst {dimension_numbers = #tpu.dot_dimension_numbers<[1], [0], [0], [1], [0, 0, 1, 1], [], []>} : vector<8x32xf32>, vector<32x128xf32>, vector<8x128xf32> -> vector<8x128xf32>
    %10 = arith.addf %8, %9 : vector<8x128xf32>
    %11 = vector.extract_strided_slice %10 {offsets = [0, 0], sizes = [8, 32], strides = [1, 1]} : vector<8x128xf32> to vector<8x32xf32>
    %12 = arith.negf %11 : vector<8x32xf32>
    %13 = math.exp %12 : vector<8x32xf32>
    %cst_9 = arith.constant 1.000000e+00 : f32
    %14 = vector.broadcast %cst_9 : f32 to vector<8x32xf32>
    %15 = arith.addf %14, %13 : vector<8x32xf32>
    %16 = arith.divf %14, %15 : vector<8x32xf32>
    %17 = vector.extract_strided_slice %10 {offsets = [0, 32], sizes = [8, 32], strides = [1, 1]} : vector<8x128xf32> to vector<8x32xf32>
    %18 = arith.negf %17 : vector<8x32xf32>
    %19 = math.exp %18 : vector<8x32xf32>
    %cst_10 = arith.constant 1.000000e+00 : f32
    %20 = vector.broadcast %cst_10 : f32 to vector<8x32xf32>
    %21 = arith.addf %20, %19 : vector<8x32xf32>
    %22 = arith.divf %20, %21 : vector<8x32xf32>
    %23 = vector.extract_strided_slice %10 {offsets = [0, 64], sizes = [8, 32], strides = [1, 1]} : vector<8x128xf32> to vector<8x32xf32>
    %24 = math.tanh %23 : vector<8x32xf32>
    %25 = vector.extract_strided_slice %10 {offsets = [0, 96], sizes = [8, 32], strides = [1, 1]} : vector<8x128xf32> to vector<8x32xf32>
    %26 = arith.negf %25 : vector<8x32xf32>
    %27 = math.exp %26 : vector<8x32xf32>
    %cst_11 = arith.constant 1.000000e+00 : f32
    %28 = vector.broadcast %cst_11 : f32 to vector<8x32xf32>
    %29 = arith.addf %28, %27 : vector<8x32xf32>
    %30 = arith.divf %28, %29 : vector<8x32xf32>
    %31 = arith.mulf %22, %5 : vector<8x32xf32>
    %32 = arith.mulf %16, %24 : vector<8x32xf32>
    %33 = arith.addf %31, %32 : vector<8x32xf32>
    %34 = math.tanh %33 : vector<8x32xf32>
    %35 = arith.mulf %30, %34 : vector<8x32xf32>
    %36 = vector.extract_strided_slice %6 {offsets = [0, 1, 0], sizes = [8, 1, 128], strides = [1, 1, 1]} : vector<8x8x128xf32> to vector<8x1x128xf32>
    %37 = vector.shape_cast %36 : vector<8x1x128xf32> to vector<8x128xf32>
    %cst_12 = arith.constant dense<0.000000e+00> : vector<8x128xf32>
    %38 = tpu.matmul %35, %3, %cst_12 {dimension_numbers = #tpu.dot_dimension_numbers<[1], [0], [0], [1], [0, 0, 1, 1], [], []>} : vector<8x32xf32>, vector<32x128xf32>, vector<8x128xf32> -> vector<8x128xf32>
    %39 = arith.addf %37, %38 : vector<8x128xf32>
    %40 = vector.extract_strided_slice %39 {offsets = [0, 0], sizes = [8, 32], strides = [1, 1]} : vector<8x128xf32> to vector<8x32xf32>
    %41 = arith.negf %40 : vector<8x32xf32>
    %42 = math.exp %41 : vector<8x32xf32>
    %cst_13 = arith.constant 1.000000e+00 : f32
    %43 = vector.broadcast %cst_13 : f32 to vector<8x32xf32>
    %44 = arith.addf %43, %42 : vector<8x32xf32>
    %45 = arith.divf %43, %44 : vector<8x32xf32>
    %46 = vector.extract_strided_slice %39 {offsets = [0, 32], sizes = [8, 32], strides = [1, 1]} : vector<8x128xf32> to vector<8x32xf32>
    %47 = arith.negf %46 : vector<8x32xf32>
    %48 = math.exp %47 : vector<8x32xf32>
    %cst_14 = arith.constant 1.000000e+00 : f32
    %49 = vector.broadcast %cst_14 : f32 to vector<8x32xf32>
    %50 = arith.addf %49, %48 : vector<8x32xf32>
    %51 = arith.divf %49, %50 : vector<8x32xf32>
    %52 = vector.extract_strided_slice %39 {offsets = [0, 64], sizes = [8, 32], strides = [1, 1]} : vector<8x128xf32> to vector<8x32xf32>
    %53 = math.tanh %52 : vector<8x32xf32>
    %54 = vector.extract_strided_slice %39 {offsets = [0, 96], sizes = [8, 32], strides = [1, 1]} : vector<8x128xf32> to vector<8x32xf32>
    %55 = arith.negf %54 : vector<8x32xf32>
    %56 = math.exp %55 : vector<8x32xf32>
    %cst_15 = arith.constant 1.000000e+00 : f32
    %57 = vector.broadcast %cst_15 : f32 to vector<8x32xf32>
    %58 = arith.addf %57, %56 : vector<8x32xf32>
    %59 = arith.divf %57, %58 : vector<8x32xf32>
    %60 = arith.mulf %51, %33 : vector<8x32xf32>
    %61 = arith.mulf %45, %53 : vector<8x32xf32>
    %62 = arith.addf %60, %61 : vector<8x32xf32>
    %63 = math.tanh %62 : vector<8x32xf32>
    %64 = arith.mulf %59, %63 : vector<8x32xf32>
    %65 = vector.extract_strided_slice %6 {offsets = [0, 2, 0], sizes = [8, 1, 128], strides = [1, 1, 1]} : vector<8x8x128xf32> to vector<8x1x128xf32>
    %66 = vector.shape_cast %65 : vector<8x1x128xf32> to vector<8x128xf32>
    %cst_16 = arith.constant dense<0.000000e+00> : vector<8x128xf32>
    %67 = tpu.matmul %64, %3, %cst_16 {dimension_numbers = #tpu.dot_dimension_numbers<[1], [0], [0], [1], [0, 0, 1, 1], [], []>} : vector<8x32xf32>, vector<32x128xf32>, vector<8x128xf32> -> vector<8x128xf32>
    %68 = arith.addf %66, %67 : vector<8x128xf32>
    %69 = vector.extract_strided_slice %68 {offsets = [0, 0], sizes = [8, 32], strides = [1, 1]} : vector<8x128xf32> to vector<8x32xf32>
    %70 = arith.negf %69 : vector<8x32xf32>
    %71 = math.exp %70 : vector<8x32xf32>
    %cst_17 = arith.constant 1.000000e+00 : f32
    %72 = vector.broadcast %cst_17 : f32 to vector<8x32xf32>
    %73 = arith.addf %72, %71 : vector<8x32xf32>
    %74 = arith.divf %72, %73 : vector<8x32xf32>
    %75 = vector.extract_strided_slice %68 {offsets = [0, 32], sizes = [8, 32], strides = [1, 1]} : vector<8x128xf32> to vector<8x32xf32>
    %76 = arith.negf %75 : vector<8x32xf32>
    %77 = math.exp %76 : vector<8x32xf32>
    %cst_18 = arith.constant 1.000000e+00 : f32
    %78 = vector.broadcast %cst_18 : f32 to vector<8x32xf32>
    %79 = arith.addf %78, %77 : vector<8x32xf32>
    %80 = arith.divf %78, %79 : vector<8x32xf32>
    %81 = vector.extract_strided_slice %68 {offsets = [0, 64], sizes = [8, 32], strides = [1, 1]} : vector<8x128xf32> to vector<8x32xf32>
    %82 = math.tanh %81 : vector<8x32xf32>
    %83 = vector.extract_strided_slice %68 {offsets = [0, 96], sizes = [8, 32], strides = [1, 1]} : vector<8x128xf32> to vector<8x32xf32>
    %84 = arith.negf %83 : vector<8x32xf32>
    %85 = math.exp %84 : vector<8x32xf32>
    %cst_19 = arith.constant 1.000000e+00 : f32
    %86 = vector.broadcast %cst_19 : f32 to vector<8x32xf32>
    %87 = arith.addf %86, %85 : vector<8x32xf32>
    %88 = arith.divf %86, %87 : vector<8x32xf32>
    %89 = arith.mulf %80, %62 : vector<8x32xf32>
    %90 = arith.mulf %74, %82 : vector<8x32xf32>
    %91 = arith.addf %89, %90 : vector<8x32xf32>
    %92 = math.tanh %91 : vector<8x32xf32>
    %93 = arith.mulf %88, %92 : vector<8x32xf32>
    %94 = vector.extract_strided_slice %6 {offsets = [0, 3, 0], sizes = [8, 1, 128], strides = [1, 1, 1]} : vector<8x8x128xf32> to vector<8x1x128xf32>
    %95 = vector.shape_cast %94 : vector<8x1x128xf32> to vector<8x128xf32>
    %cst_20 = arith.constant dense<0.000000e+00> : vector<8x128xf32>
    %96 = tpu.matmul %93, %3, %cst_20 {dimension_numbers = #tpu.dot_dimension_numbers<[1], [0], [0], [1], [0, 0, 1, 1], [], []>} : vector<8x32xf32>, vector<32x128xf32>, vector<8x128xf32> -> vector<8x128xf32>
    %97 = arith.addf %95, %96 : vector<8x128xf32>
    %98 = vector.extract_strided_slice %97 {offsets = [0, 0], sizes = [8, 32], strides = [1, 1]} : vector<8x128xf32> to vector<8x32xf32>
    %99 = arith.negf %98 : vector<8x32xf32>
    %100 = math.exp %99 : vector<8x32xf32>
    %cst_21 = arith.constant 1.000000e+00 : f32
    %101 = vector.broadcast %cst_21 : f32 to vector<8x32xf32>
    %102 = arith.addf %101, %100 : vector<8x32xf32>
    %103 = arith.divf %101, %102 : vector<8x32xf32>
    %104 = vector.extract_strided_slice %97 {offsets = [0, 32], sizes = [8, 32], strides = [1, 1]} : vector<8x128xf32> to vector<8x32xf32>
    %105 = arith.negf %104 : vector<8x32xf32>
    %106 = math.exp %105 : vector<8x32xf32>
    %cst_22 = arith.constant 1.000000e+00 : f32
    %107 = vector.broadcast %cst_22 : f32 to vector<8x32xf32>
    %108 = arith.addf %107, %106 : vector<8x32xf32>
    %109 = arith.divf %107, %108 : vector<8x32xf32>
    %110 = vector.extract_strided_slice %97 {offsets = [0, 64], sizes = [8, 32], strides = [1, 1]} : vector<8x128xf32> to vector<8x32xf32>
    %111 = math.tanh %110 : vector<8x32xf32>
    %112 = vector.extract_strided_slice %97 {offsets = [0, 96], sizes = [8, 32], strides = [1, 1]} : vector<8x128xf32> to vector<8x32xf32>
    %113 = arith.negf %112 : vector<8x32xf32>
    %114 = math.exp %113 : vector<8x32xf32>
    %cst_23 = arith.constant 1.000000e+00 : f32
    %115 = vector.broadcast %cst_23 : f32 to vector<8x32xf32>
    %116 = arith.addf %115, %114 : vector<8x32xf32>
    %117 = arith.divf %115, %116 : vector<8x32xf32>
    %118 = arith.mulf %109, %91 : vector<8x32xf32>
    %119 = arith.mulf %103, %111 : vector<8x32xf32>
    %120 = arith.addf %118, %119 : vector<8x32xf32>
    %121 = math.tanh %120 : vector<8x32xf32>
    %122 = arith.mulf %117, %121 : vector<8x32xf32>
    %123 = vector.extract_strided_slice %6 {offsets = [0, 4, 0], sizes = [8, 1, 128], strides = [1, 1, 1]} : vector<8x8x128xf32> to vector<8x1x128xf32>
    %124 = vector.shape_cast %123 : vector<8x1x128xf32> to vector<8x128xf32>
    %cst_24 = arith.constant dense<0.000000e+00> : vector<8x128xf32>
    %125 = tpu.matmul %122, %3, %cst_24 {dimension_numbers = #tpu.dot_dimension_numbers<[1], [0], [0], [1], [0, 0, 1, 1], [], []>} : vector<8x32xf32>, vector<32x128xf32>, vector<8x128xf32> -> vector<8x128xf32>
    %126 = arith.addf %124, %125 : vector<8x128xf32>
    %127 = vector.extract_strided_slice %126 {offsets = [0, 0], sizes = [8, 32], strides = [1, 1]} : vector<8x128xf32> to vector<8x32xf32>
    %128 = arith.negf %127 : vector<8x32xf32>
    %129 = math.exp %128 : vector<8x32xf32>
    %cst_25 = arith.constant 1.000000e+00 : f32
    %130 = vector.broadcast %cst_25 : f32 to vector<8x32xf32>
    %131 = arith.addf %130, %129 : vector<8x32xf32>
    %132 = arith.divf %130, %131 : vector<8x32xf32>
    %133 = vector.extract_strided_slice %126 {offsets = [0, 32], sizes = [8, 32], strides = [1, 1]} : vector<8x128xf32> to vector<8x32xf32>
    %134 = arith.negf %133 : vector<8x32xf32>
    %135 = math.exp %134 : vector<8x32xf32>
    %cst_26 = arith.constant 1.000000e+00 : f32
    %136 = vector.broadcast %cst_26 : f32 to vector<8x32xf32>
    %137 = arith.addf %136, %135 : vector<8x32xf32>
    %138 = arith.divf %136, %137 : vector<8x32xf32>
    %139 = vector.extract_strided_slice %126 {offsets = [0, 64], sizes = [8, 32], strides = [1, 1]} : vector<8x128xf32> to vector<8x32xf32>
    %140 = math.tanh %139 : vector<8x32xf32>
    %141 = vector.extract_strided_slice %126 {offsets = [0, 96], sizes = [8, 32], strides = [1, 1]} : vector<8x128xf32> to vector<8x32xf32>
    %142 = arith.negf %141 : vector<8x32xf32>
    %143 = math.exp %142 : vector<8x32xf32>
    %cst_27 = arith.constant 1.000000e+00 : f32
    %144 = vector.broadcast %cst_27 : f32 to vector<8x32xf32>
    %145 = arith.addf %144, %143 : vector<8x32xf32>
    %146 = arith.divf %144, %145 : vector<8x32xf32>
    %147 = arith.mulf %138, %120 : vector<8x32xf32>
    %148 = arith.mulf %132, %140 : vector<8x32xf32>
    %149 = arith.addf %147, %148 : vector<8x32xf32>
    %150 = math.tanh %149 : vector<8x32xf32>
    %151 = arith.mulf %146, %150 : vector<8x32xf32>
    %152 = vector.extract_strided_slice %6 {offsets = [0, 5, 0], sizes = [8, 1, 128], strides = [1, 1, 1]} : vector<8x8x128xf32> to vector<8x1x128xf32>
    %153 = vector.shape_cast %152 : vector<8x1x128xf32> to vector<8x128xf32>
    %cst_28 = arith.constant dense<0.000000e+00> : vector<8x128xf32>
    %154 = tpu.matmul %151, %3, %cst_28 {dimension_numbers = #tpu.dot_dimension_numbers<[1], [0], [0], [1], [0, 0, 1, 1], [], []>} : vector<8x32xf32>, vector<32x128xf32>, vector<8x128xf32> -> vector<8x128xf32>
    %155 = arith.addf %153, %154 : vector<8x128xf32>
    %156 = vector.extract_strided_slice %155 {offsets = [0, 0], sizes = [8, 32], strides = [1, 1]} : vector<8x128xf32> to vector<8x32xf32>
    %157 = arith.negf %156 : vector<8x32xf32>
    %158 = math.exp %157 : vector<8x32xf32>
    %cst_29 = arith.constant 1.000000e+00 : f32
    %159 = vector.broadcast %cst_29 : f32 to vector<8x32xf32>
    %160 = arith.addf %159, %158 : vector<8x32xf32>
    %161 = arith.divf %159, %160 : vector<8x32xf32>
    %162 = vector.extract_strided_slice %155 {offsets = [0, 32], sizes = [8, 32], strides = [1, 1]} : vector<8x128xf32> to vector<8x32xf32>
    %163 = arith.negf %162 : vector<8x32xf32>
    %164 = math.exp %163 : vector<8x32xf32>
    %cst_30 = arith.constant 1.000000e+00 : f32
    %165 = vector.broadcast %cst_30 : f32 to vector<8x32xf32>
    %166 = arith.addf %165, %164 : vector<8x32xf32>
    %167 = arith.divf %165, %166 : vector<8x32xf32>
    %168 = vector.extract_strided_slice %155 {offsets = [0, 64], sizes = [8, 32], strides = [1, 1]} : vector<8x128xf32> to vector<8x32xf32>
    %169 = math.tanh %168 : vector<8x32xf32>
    %170 = vector.extract_strided_slice %155 {offsets = [0, 96], sizes = [8, 32], strides = [1, 1]} : vector<8x128xf32> to vector<8x32xf32>
    %171 = arith.negf %170 : vector<8x32xf32>
    %172 = math.exp %171 : vector<8x32xf32>
    %cst_31 = arith.constant 1.000000e+00 : f32
    %173 = vector.broadcast %cst_31 : f32 to vector<8x32xf32>
    %174 = arith.addf %173, %172 : vector<8x32xf32>
    %175 = arith.divf %173, %174 : vector<8x32xf32>
    %176 = arith.mulf %167, %149 : vector<8x32xf32>
    %177 = arith.mulf %161, %169 : vector<8x32xf32>
    %178 = arith.addf %176, %177 : vector<8x32xf32>
    %179 = math.tanh %178 : vector<8x32xf32>
    %180 = arith.mulf %175, %179 : vector<8x32xf32>
    %181 = vector.extract_strided_slice %6 {offsets = [0, 6, 0], sizes = [8, 1, 128], strides = [1, 1, 1]} : vector<8x8x128xf32> to vector<8x1x128xf32>
    %182 = vector.shape_cast %181 : vector<8x1x128xf32> to vector<8x128xf32>
    %cst_32 = arith.constant dense<0.000000e+00> : vector<8x128xf32>
    %183 = tpu.matmul %180, %3, %cst_32 {dimension_numbers = #tpu.dot_dimension_numbers<[1], [0], [0], [1], [0, 0, 1, 1], [], []>} : vector<8x32xf32>, vector<32x128xf32>, vector<8x128xf32> -> vector<8x128xf32>
    %184 = arith.addf %182, %183 : vector<8x128xf32>
    %185 = vector.extract_strided_slice %184 {offsets = [0, 0], sizes = [8, 32], strides = [1, 1]} : vector<8x128xf32> to vector<8x32xf32>
    %186 = arith.negf %185 : vector<8x32xf32>
    %187 = math.exp %186 : vector<8x32xf32>
    %cst_33 = arith.constant 1.000000e+00 : f32
    %188 = vector.broadcast %cst_33 : f32 to vector<8x32xf32>
    %189 = arith.addf %188, %187 : vector<8x32xf32>
    %190 = arith.divf %188, %189 : vector<8x32xf32>
    %191 = vector.extract_strided_slice %184 {offsets = [0, 32], sizes = [8, 32], strides = [1, 1]} : vector<8x128xf32> to vector<8x32xf32>
    %192 = arith.negf %191 : vector<8x32xf32>
    %193 = math.exp %192 : vector<8x32xf32>
    %cst_34 = arith.constant 1.000000e+00 : f32
    %194 = vector.broadcast %cst_34 : f32 to vector<8x32xf32>
    %195 = arith.addf %194, %193 : vector<8x32xf32>
    %196 = arith.divf %194, %195 : vector<8x32xf32>
    %197 = vector.extract_strided_slice %184 {offsets = [0, 64], sizes = [8, 32], strides = [1, 1]} : vector<8x128xf32> to vector<8x32xf32>
    %198 = math.tanh %197 : vector<8x32xf32>
    %199 = vector.extract_strided_slice %184 {offsets = [0, 96], sizes = [8, 32], strides = [1, 1]} : vector<8x128xf32> to vector<8x32xf32>
    %200 = arith.negf %199 : vector<8x32xf32>
    %201 = math.exp %200 : vector<8x32xf32>
    %cst_35 = arith.constant 1.000000e+00 : f32
    %202 = vector.broadcast %cst_35 : f32 to vector<8x32xf32>
    %203 = arith.addf %202, %201 : vector<8x32xf32>
    %204 = arith.divf %202, %203 : vector<8x32xf32>
    %205 = arith.mulf %196, %178 : vector<8x32xf32>
    %206 = arith.mulf %190, %198 : vector<8x32xf32>
    %207 = arith.addf %205, %206 : vector<8x32xf32>
    %208 = math.tanh %207 : vector<8x32xf32>
    %209 = arith.mulf %204, %208 : vector<8x32xf32>
    %210 = vector.extract_strided_slice %6 {offsets = [0, 7, 0], sizes = [8, 1, 128], strides = [1, 1, 1]} : vector<8x8x128xf32> to vector<8x1x128xf32>
    %211 = vector.shape_cast %210 : vector<8x1x128xf32> to vector<8x128xf32>
    %cst_36 = arith.constant dense<0.000000e+00> : vector<8x128xf32>
    %212 = tpu.matmul %209, %3, %cst_36 {dimension_numbers = #tpu.dot_dimension_numbers<[1], [0], [0], [1], [0, 0, 1, 1], [], []>} : vector<8x32xf32>, vector<32x128xf32>, vector<8x128xf32> -> vector<8x128xf32>
    %213 = arith.addf %211, %212 : vector<8x128xf32>
    %214 = vector.extract_strided_slice %213 {offsets = [0, 0], sizes = [8, 32], strides = [1, 1]} : vector<8x128xf32> to vector<8x32xf32>
    %215 = arith.negf %214 : vector<8x32xf32>
    %216 = math.exp %215 : vector<8x32xf32>
    %cst_37 = arith.constant 1.000000e+00 : f32
    %217 = vector.broadcast %cst_37 : f32 to vector<8x32xf32>
    %218 = arith.addf %217, %216 : vector<8x32xf32>
    %219 = arith.divf %217, %218 : vector<8x32xf32>
    %220 = vector.extract_strided_slice %213 {offsets = [0, 32], sizes = [8, 32], strides = [1, 1]} : vector<8x128xf32> to vector<8x32xf32>
    %221 = arith.negf %220 : vector<8x32xf32>
    %222 = math.exp %221 : vector<8x32xf32>
    %cst_38 = arith.constant 1.000000e+00 : f32
    %223 = vector.broadcast %cst_38 : f32 to vector<8x32xf32>
    %224 = arith.addf %223, %222 : vector<8x32xf32>
    %225 = arith.divf %223, %224 : vector<8x32xf32>
    %226 = vector.extract_strided_slice %213 {offsets = [0, 64], sizes = [8, 32], strides = [1, 1]} : vector<8x128xf32> to vector<8x32xf32>
    %227 = math.tanh %226 : vector<8x32xf32>
    %228 = vector.extract_strided_slice %213 {offsets = [0, 96], sizes = [8, 32], strides = [1, 1]} : vector<8x128xf32> to vector<8x32xf32>
    %229 = arith.negf %228 : vector<8x32xf32>
    %230 = math.exp %229 : vector<8x32xf32>
    %cst_39 = arith.constant 1.000000e+00 : f32
    %231 = vector.broadcast %cst_39 : f32 to vector<8x32xf32>
    %232 = arith.addf %231, %230 : vector<8x32xf32>
    %233 = arith.divf %231, %232 : vector<8x32xf32>
    %234 = arith.mulf %225, %207 : vector<8x32xf32>
    %235 = arith.mulf %219, %227 : vector<8x32xf32>
    %236 = arith.addf %234, %235 : vector<8x32xf32>
    %237 = math.tanh %236 : vector<8x32xf32>
    %238 = arith.mulf %233, %237 : vector<8x32xf32>
    %239 = vector.shape_cast %35 : vector<8x32xf32> to vector<8x1x32xf32>
    %240 = vector.shape_cast %64 : vector<8x32xf32> to vector<8x1x32xf32>
    %241 = vector.shape_cast %93 : vector<8x32xf32> to vector<8x1x32xf32>
    %242 = vector.shape_cast %122 : vector<8x32xf32> to vector<8x1x32xf32>
    %243 = vector.shape_cast %151 : vector<8x32xf32> to vector<8x1x32xf32>
    %244 = vector.shape_cast %180 : vector<8x32xf32> to vector<8x1x32xf32>
    %245 = vector.shape_cast %209 : vector<8x32xf32> to vector<8x1x32xf32>
    %246 = vector.shape_cast %238 : vector<8x32xf32> to vector<8x1x32xf32>
    %247 = tpu.concatenate %239, %240, %241, %242, %243, %244, %245, %246 in 1 : vector<8x1x32xf32>, vector<8x1x32xf32>, vector<8x1x32xf32>, vector<8x1x32xf32>, vector<8x1x32xf32>, vector<8x1x32xf32>, vector<8x1x32xf32>, vector<8x1x32xf32> -> vector<8x8x32xf32>
    %c0_40 = arith.constant 0 : index
    %c0_41 = arith.constant 0 : index
    %c0_42 = arith.constant 0 : index
    %248 = vector.load %arg4[%c0_40, %c0_41, %c0_42] : memref<8x8x32xf32, #tpu.memory_space<vmem>>, vector<8x8x32xf32>
    tpu.vector_store %arg4[%c0_40, %c0_41, %c0_42], %247 {strides = array<i32>} : memref<8x8x32xf32, #tpu.memory_space<vmem>>, vector<8x8x32xf32>,
    %c0_43 = arith.constant 0 : index
    %c0_44 = arith.constant 0 : index
    %249 = vector.load %arg5[%c0_43, %c0_44] : memref<8x32xf32, #tpu.memory_space<vmem>>, vector<8x32xf32>
    tpu.vector_store %arg5[%c0_43, %c0_44], %238 {strides = array<i32>} : memref<8x32xf32, #tpu.memory_space<vmem>>, vector<8x32xf32>,
    %c0_45 = arith.constant 0 : index
    %c0_46 = arith.constant 0 : index
    %250 = vector.load %arg6[%c0_45, %c0_46] : memref<8x32xf32, #tpu.memory_space<vmem>>, vector<8x32xf32>
    tpu.vector_store %arg6[%c0_45, %c0_46], %236 {strides = array<i32>} : memref<8x32xf32, #tpu.memory_space<vmem>>, vector<8x32xf32>,
    return
  }
  func.func @transform_0(%arg0: i32, %arg1: i32) -> (i32, i32, i32) {
    %c0_i32 = arith.constant 0 : i32
    %c0_i32_0 = arith.constant 0 : i32
    return %arg0, %arg1, %c0_i32 : i32, i32, i32
  }
  func.func @transform_1(%arg0: i32, %arg1: i32) -> (i32, i32) {
    %c0_i32 = arith.constant 0 : i32
    %c0_i32_0 = arith.constant 0 : i32
    %c0_i32_1 = arith.constant 0 : i32
    return %c0_i32, %c0_i32_0 : i32, i32
  }
  func.func @transform_2(%arg0: i32, %arg1: i32) -> (i32, i32, i32) {
    %c0_i32 = arith.constant 0 : i32
    %c0_i32_0 = arith.constant 0 : i32
    return %arg0, %arg1, %c0_i32 : i32, i32, i32
  }
  func.func @transform_3(%arg0: i32, %arg1: i32) -> (i32, i32) {
    %c0_i32 = arith.constant 0 : i32
    %c0_i32_0 = arith.constant 0 : i32
    return %arg0, %c0_i32 : i32, i32
  }
  func.func @transform_4(%arg0: i32, %arg1: i32) -> (i32, i32) {
    %c0_i32 = arith.constant 0 : i32
    %c0_i32_0 = arith.constant 0 : i32
    return %arg0, %c0_i32 : i32, i32
  }
}

</mosaic_0001>

<bundles_post_ra>
// kernel: encoder_forward.1
= control target key start
LH: loop header
LB: loop body
LE: loop exit
PB: predicated region body
PF: predicated region fallthrough
CT: control target
= control target key end

     0   :  { %vm18_vm0 = vcmask 261120   ;;  %v3673_v0 = vmov 0.0|0.0   ;;  %vm3674_vm1 = vmmov 0   ;;  %v3675_v4 = vmov 0.0   ;;  %s3676_s14 = smov 64   ;;  %s3677_s21 = smov 32   ;;  %s5096_s1 = inlined_call_operand.vmem [shape: f32[32,128], index: 1, kind: input, shape index: {}]   ;;  %s5097_s3 = inlined_call_operand.vmem [shape: f32[8,32], index: 3, kind: output, shape index: {1}]   ;;  %s5098_s4 = inlined_call_operand.vmem [shape: f32[8,32], index: 4, kind: output, shape index: {2}]   ;;  %s5099_s0 = inlined_call_operand.vmem [shape: f32[8,8,128], index: 0, kind: input, shape index: {}]   ;;  %s5100_s2 = inlined_call_operand.vmem [shape: f32[8,8,32], index: 2, kind: output, shape index: {0}]  }
   0x1   :  { %3091 = vmatprep.subr.bf16.mxu0 %v3673_v0  ;;  %v21_v1 = vld [vmem:[%s5096_s1] sm:$0xff]  ;;  %v22_v2 = vld [vmem:[%s5096_s1 + $0x8] sm:$0xff]  ;;  %v23_v3 = vld [vmem:[%s5096_s1 + $0x10] sm:$0xff]  ;;  %3011 = vmatprep.mubr.msk.f32.mxu0 %vm3674_vm1, %v3675_v4  ;;  %19 = vst.msk [vmem:[%s5097_s3] sm:$0xff] %vm18_vm0, %v3675_v4  ;;  %vm366_vm2 = vcmask 1041409   ;;  %vm369_vm3 = vcmask 1042434  }
   0x2   :  { %v3721_v5 = vpack.c.bf16 %v22_v2, %v21_v1  ;;  %v24_v6 = vld [vmem:[%s5096_s1 + $0x18] sm:$0xff]  ;;  %3097 = vmatprep.subr.bf16.mxu1 %v3673_v0  ;;  %3022 = vmatprep.mubr.msk.f32.mxu1 %vm3674_vm1, %v3675_v4  ;;  %20 = vst.msk [vmem:[%s5098_s4] sm:$0xff] %vm18_vm0, %v3675_v4  ;;  %v3757_v9 = vld [vmem:[%s5099_s0] sm:$0xff]  ;;  %v3769_v17 = vld [vmem:[%s5099_s0 + $0x28] sm:$0xff]  ;;  %vm372_vm4 = vcmask 1043459   ;;  %vm375_vm5 = vcmask 1044484  }
   0x3   :  { %v3730_v7 = vpack.c.bf16 %v24_v6, %v23_v3  ;;  %v3762_v11 = vld [vmem:[%s5099_s0 + $0x18] sm:$0xff]  ;;  %v3782_v22 = vld [vmem:[%s5099_s0 + $0x8] sm:$0xff]  ;;  %v3792_v27 = vld [vmem:[%s5099_s0 + $0x10] sm:$0xff]  ;;  %vm378_vm6 = vcmask 1045509   ;;  %vm381_vm7 = vcmask 1046534   ;;  %vm384_vm8 = vcmask 1047559  }
   0x4   :  { %3093 = vmatpush3.bf16.msra.mxu0 %v3721_v5  ;;  %3099 = vmatpush3.bf16.msra.mxu1 %v3721_v5  ;;  %v3774_v19 = vld [vmem:[%s5099_s0 + $0x38] sm:$0xff]  ;;  %v3800_v31 = vld [vmem:[%s5099_s0 + $0x20] sm:$0xff]  ;;  %v3807_v34 = vld [vmem:[%s5099_s0 + $0x30] sm:$0xff]  ;;  %vm2716_vm9 = vcmask 1040384   ;;  %vm2725_vm10 = vcmask 1041408   ;;  %vm2734_vm11 = vcmask 1042432  }
   0x5   :  { %3094 = vmatprep.subr.bf16.mxu0 %v3673_v0  ;;  %3100 = vmatprep.subr.bf16.mxu1 %v3673_v0  ;;  %vm2743_vm12 = vcmask 1043456   ;;  %vm2752_vm13 = vcmask 1044480   ;;  %vm2761_vm14 = vcmask 1045504   ;;  %vm2770_vm15 = vcmask 1046528  }
   0x8   :  { %3096 = vmatpush3.bf16.msra.mxu0 %v3730_v7  ;;  %v25_v8 = vld [vmem:[%s5097_s3] sm:$0xff]  ;;  %3102 = vmatpush3.bf16.msra.mxu1 %v3730_v7 }
   0x9   :  { %3103 = vmatprep.subr.bf16.mxu0 %v3673_v0  ;;  %3109 = vmatprep.subr.bf16.mxu1 %v3673_v0  ;;  %v26_v37 = vld [vmem:[%s5098_s4] sm:$0xff] }
   0xa   :  { %v191_v40 = vrot.slane %v26_v37, 2  ;;  %v192_v42 = vrot.slane %v26_v37, 3  ;;  %v193_v44 = vrot.slane %v26_v37, 4  ;;  %v190_v46 = vrot.slane %v26_v37, 1 }
   0xb   :  { %3012 = vmatmul.mubr.msk.f32.vlgmr.msra.gmra.mrb[0].mxu0 %vm18_vm0, %v25_v8  ;;  %v194_v47 = vrot.slane %v26_v37, 5  ;;  %v195_v48 = vrot.slane %v26_v37, 6  ;;  %v196_v49 = vrot.slane %v26_v37, 7 }
   0xc   :  { %3105 = vmatpush3.bf16.msra.mxu0 %v3721_v5  ;;  %3033 = vmatprep.mubr.msk.f32.mxu0 %vm3674_vm1, %v3675_v4 }
   0xd   :  { %3106 = vmatprep.subr.bf16.mxu0 %v3673_v0 }
  0x10   :  { %3108 = vmatpush3.bf16.msra.mxu0 %v3730_v7 }
  0x11   :  { %3115 = vmatprep.subr.bf16.mxu0 %v3673_v0 }
  0xde   :  { %v105_v10 = vpop.f32.mrb[0].mxu0 }
  0xdf   :  { %v112_v12 = vrot.slane %v105_v10, 3  ;;  %v3013_v13 = vpop.f32.mrb[1].mxu0  ;;  %v125_v14 = vadd.f32 %v105_v10, %v3757_v9  ;;  %v114_v16 = vrot.slane %v105_v10, 5  ;;  %v116_v18 = vrot.slane %v105_v10, 7 }
  0xe0   :  { %v110_v21 = vrot.slane %v105_v10, 1  ;;  %v111_v25 = vrot.slane %v105_v10, 2  ;;  %v113_v29 = vrot.slane %v105_v10, 4  ;;  %v115_v32 = vrot.slane %v105_v10, 6 }
  0xe1   :  { %v128_v15 = vadd.f32 %v112_v12, %v3762_v11  ;;  %3145 = vtanh.f32 %v125_v14  ;;  %v3777_v20 = vadd.f32 %v114_v16, %v3769_v17  ;;  %v3785_v23 = vadd.f32 %v116_v18, %v3774_v19 }
  0xe2   :  { %v126_v26 = vadd.f32 %v110_v21, %v3782_v22  ;;  %v127_v30 = vadd.f32 %v111_v25, %v3792_v27  ;;  %v129_v33 = vadd.f32 %v113_v29, %v3800_v31  ;;  %v131_v36 = vadd.f32 %v115_v32, %v3807_v34 }
  0xe3   :  { %3147 = vtanh.f32 %v128_v15  ;;  %v2892_v50 = vmul.f32 -1.442695, %v125_v14  ;;  %v2895_v51 = vmul.f32 -1.442695, %v128_v15  ;;  %v2897_v59 = vmul.f32 -1.442695, %v3777_v20 }
  0xe4   :  { %3149 = vtanh.f32 %v3777_v20  ;;  %v2893_v53 = vmul.f32 -1.442695, %v126_v26  ;;  %v2894_v56 = vmul.f32 -1.442695, %v127_v30  ;;  %v2896_v58 = vmul.f32 -1.442695, %v129_v33 }
  0xe5   :  { %3151 = vtanh.f32 %v3785_v23  ;;  %v2898_v60 = vmul.f32 -1.442695, %v131_v36  ;;  %v2899_v62 = vmul.f32 -1.442695, %v3785_v23 }
  0xe6   :  { %3153 = vtanh.f32 %v126_v26 }
  0xe7   :  { %3155 = vtanh.f32 %v127_v30 }
  0xe8   :  { %3157 = vtanh.f32 %v129_v33 }
  0xe9   :  { %3159 = vtanh.f32 %v131_v36 }
  0xea   :  { %3161 = vpow2.f32 %v2892_v50 }
  0xeb   :  { %v3146_v24 = vpop.eup %3145  ;;  %3163 = vpow2.f32 %v2895_v51 }
  0xec   :  { %237 = vrot.lane.b32.xlu1 %v3146_v24, %s3676_s14  ;;  %3165 = vpow2.f32 %v2893_v53 }
  0xed   :  { %v3148_v28 = vpop.eup %3147 }
  0xee   :  { %v3150_v35 = vpop.eup %3149 }
  0xef   :  { %v3152_v38 = vpop.eup %3151 }
  0xf0   :  { %243 = vrot.lane.b32.xlu1 %v3148_v28, %s3676_s14  ;;  %v3154_v39 = vpop.eup %3153 }
  0xf1   :  { %239 = vrot.lane.b32.xlu0 %v3154_v39, %s3676_s14  ;;  %v3156_v41 = vpop.eup %3155 }
  0xf2   :  { %v3158_v43 = vpop.eup %3157 }
  0xf3   :  { %v3160_v45 = vpop.eup %3159 }
  0xf4   :  { %247 = vrot.lane.b32.xlu1 %v3150_v35, %s3676_s14  ;;  %v3162_v52 = vpop.eup %3161 }
  0xf5   :  { %241 = vrot.lane.b32.xlu0 %v3156_v41, %s3676_s14  ;;  %v157_v54 = vadd.f32 1.0, %v3162_v52  ;;  %v3164_v55 = vpop.eup %3163 }
  0xf6   :  { %v160_v57 = vadd.f32 1.0, %v3164_v55  ;;  %v3166_v61 = vpop.eup %3165 }
  0xf7   :  { %3167 = vrcp.f32 %v157_v54  ;;  %v158_v1 = vadd.f32 1.0, %v3166_v61 }
  0xf8   :  { %251 = vrot.lane.b32.xlu1 %v3152_v38, %s3676_s14  ;;  %3169 = vpow2.f32 %v2894_v56 }
  0xf9   :  { %245 = vrot.lane.b32.xlu0 %v3158_v43, %s3676_s14  ;;  %3171 = vrcp.f32 %v160_v57 }
  0xfa   :  { %3173 = vpow2.f32 %v2896_v58 }
  0xfb   :  { %3175 = vpow2.f32 %v2897_v59 }
  0xfc   :  { %201 = vrot.lane.b32.xlu1 %v191_v40, %s3677_s21  ;;  %3177 = vpow2.f32 %v2898_v60 }
  0xfd   :  { %249 = vrot.lane.b32.xlu0 %v3160_v45, %s3676_s14  ;;  %3179 = vpow2.f32 %v2899_v62 }
  0xfe   :  { %3181 = vrcp.f32 %v158_v1 }
 0x100   :  { %203 = vrot.lane.b32.xlu1 %v192_v42, %s3677_s21 }
 0x101   :  { %199 = vrot.lane.b32.xlu0 %v190_v46, %s3677_s21  ;;  %v3829_v63 = vpop.eup %3167 }
 0x102   :  { %v3170_v3 = vpop.eup %3169 }
 0x103   :  { %v3833_v8 = vpop.eup %3171  ;;  %v159_v12 = vadd.f32 1.0, %v3170_v3 }
 0x104   :  { %205 = vrot.lane.b32.xlu1 %v193_v44, %s3677_s21  ;;  %v3174_v13 = vpop.eup %3173 }
 0x105   :  { %197 = vrot.lane.b32.xlu0 %v26_v37, %s3677_s21  ;;  %v3176_v15 = vpop.eup %3175  ;;  %3183 = vrcp.f32 %v159_v12  ;;  %v161_v16 = vadd.f32 1.0, %v3174_v13 }
 0x106   :  { %v3178_v18 = vpop.eup %3177  ;;  %v162_v20 = vadd.f32 1.0, %v3176_v15 }
 0x107   :  { %3185 = vrcp.f32 %v161_v16  ;;  %v163_v21 = vadd.f32 1.0, %v3178_v18  ;;  %v3180_v23 = vpop.eup %3179 }
 0x108   :  { %207 = vrot.lane.b32.xlu1 %v194_v47, %s3677_s21  ;;  %v3837_v24 = vpop.eup %3181  ;;  %3187 = vrcp.f32 %v162_v20  ;;  %v164_v28 = vadd.f32 1.0, %v3180_v23 }
 0x109   :  { %209 = vrot.lane.b32.xlu0 %v195_v48, %s3677_s21  ;;  %3189 = vrcp.f32 %v163_v21 }
 0x10a   :  { %3191 = vrcp.f32 %v164_v28 }
 0x10d   :  { %211 = vrot.lane.b32.xlu0 %v196_v49, %s3677_s21 }
 0x10f   :  { %v3841_v29 = vpop.eup %3183 }
 0x111   :  { %v3845_v33 = vpop.eup %3185 }
 0x112   :  { %v3848_v38 = vpop.eup %3187 }
 0x113   :  { %v3851_v39 = vpop.eup %3189 }
 0x114   :  { %v3857_v44 = vpop.eup %3191 }
 0x15e   :  { %v238_v2 = vpop.permute.xlu1 %237 }
 0x15f   :  { %v261_v6 = vmul.f32 %v3829_v63, %v238_v2 }
 0x161   :  { %277 = vrot.lane.b32.xlu0 %v261_v6, %s3677_s21 }
 0x162   :  { %v244_v10 = vpop.permute.xlu1 %243 }
 0x163   :  { %v264_v14 = vmul.f32 %v3833_v8, %v244_v10  ;;  %v240_v25 = vpop.permute.xlu0 %239 }
 0x164   :  { %v262_v26 = vmul.f32 %v3837_v24, %v240_v25 }
 0x165   :  { %283 = vrot.lane.b32.xlu1 %v264_v14, %s3677_s21 }
 0x166   :  { %279 = vrot.lane.b32.xlu0 %v262_v26, %s3677_s21  ;;  %v248_v35 = vpop.permute.xlu1 %247 }
 0x167   :  { %v242_v30 = vpop.permute.xlu0 %241  ;;  %v266_v41 = vmul.f32 %v3848_v38, %v248_v35 }
 0x168   :  { %v263_v32 = vmul.f32 %v3841_v29, %v242_v30 }
 0x16a   :  { %281 = vrot.lane.b32.xlu0 %v263_v32, %s3677_s21  ;;  %v252_v43 = vpop.permute.xlu1 %251 }
 0x16b   :  { %v246_v36 = vpop.permute.xlu0 %245  ;;  %v268_v45 = vmul.f32 %v3857_v44, %v252_v43 }
 0x16c   :  { %v265_v37 = vmul.f32 %v3845_v33, %v246_v36 }
 0x16e   :  { %285 = vrot.lane.b32.xlu1 %v265_v37, %s3677_s21  ;;  %v202_v49 = vpop.permute.xlu1 %201 }
 0x16f   :  { %v250_v40 = vpop.permute.xlu0 %249  ;;  %v223_v61 = vmul.f32 %v3841_v29, %v202_v49 }
 0x170   :  { %v267_v42 = vmul.f32 %v3851_v39, %v250_v40 }
 0x172   :  { %287 = vrot.lane.b32.xlu1 %v266_v41, %s3677_s21  ;;  %289 = vrot.lane.b32.xlu0 %v267_v42, %s3677_s21  ;;  %v204_v53 = vpop.permute.xlu1 %203 }
 0x173   :  { %v200_v46 = vpop.permute.xlu0 %199  ;;  %v224_v1 = vmul.f32 %v3833_v8, %v204_v53 }
 0x174   :  { %v222_v57 = vmul.f32 %v3837_v24, %v200_v46 }
 0x176   :  { %291 = vrot.lane.b32.xlu1 %v268_v45, %s3677_s21  ;;  %v206_v55 = vpop.permute.xlu1 %205 }
 0x177   :  { %v198_v47 = vpop.permute.xlu0 %197  ;;  %v225_v10 = vmul.f32 %v3845_v33, %v206_v55 }
 0x178   :  { %v221_v51 = vmul.f32 %v3829_v63, %v198_v47 }
 0x17a   :  { %v208_v58 = vpop.permute.xlu1 %207 }
 0x17b   :  { %v210_v48 = vpop.permute.xlu0 %209  ;;  %v226_v15 = vmul.f32 %v3848_v38, %v208_v58 }
 0x17c   :  { %v227_v14 = vmul.f32 %v3851_v39, %v210_v48 }
 0x17f   :  { %v212_v50 = vpop.permute.xlu0 %211 }
 0x180   :  { %v228_v25 = vmul.f32 %v3857_v44, %v212_v50 }
 0x1d3   :  { %v278_v52 = vpop.permute.xlu0 %277 }
 0x1d4   :  { %v3862_v54 = vadd.f32 %v278_v52, %v221_v51 }
 0x1d6   :  { %3193 = vtanh.f32 %v3862_v54 }
 0x1d7   :  { %v284_v62 = vpop.permute.xlu1 %283 }
 0x1d8   :  { %v280_v59 = vpop.permute.xlu0 %279  ;;  %v3874_v6 = vadd.f32 %v284_v62, %v224_v1 }
 0x1d9   :  { %v3867_v60 = vadd.f32 %v280_v59, %v222_v57 }
 0x1db   :  { %3195 = vtanh.f32 %v3867_v60 }
 0x1dc   :  { %v282_v2 = vpop.permute.xlu0 %281 }
 0x1dd   :  { %v3872_v3 = vadd.f32 %v282_v2, %v223_v61 }
 0x1df   :  { %3197 = vtanh.f32 %v3872_v3 }
 0x1e0   :  { %v3194_v56 = vpop.eup %3193  ;;  %v286_v12 = vpop.permute.xlu1 %285  ;;  %3199 = vtanh.f32 %v3874_v6 }
 0x1e1   :  { %325 = vrot.lane.b32.xlu0 %v3194_v56, %s3676_s14  ;;  %v3878_v13 = vadd.f32 %v286_v12, %v225_v10 }
 0x1e3   :  { %3201 = vtanh.f32 %v3878_v13 }
 0x1e4   :  { %v288_v16 = vpop.permute.xlu1 %287  ;;  %v290_v18 = vpop.permute.xlu0 %289 }
 0x1e5   :  { %v3196_v20 = vpop.eup %3195  ;;  %v3884_v21 = vadd.f32 %v288_v16, %v226_v15  ;;  %v3886_v23 = vadd.f32 %v290_v18, %v227_v14 }
 0x1e6   :  { %327 = vrot.lane.b32.xlu0 %v3196_v20, %s3676_s14 }
 0x1e7   :  { %3203 = vtanh.f32 %v3884_v21 }
 0x1e8   :  { %3205 = vtanh.f32 %v3886_v23  ;;  %v292_v26 = vpop.permute.xlu1 %291 }
 0x1e9   :  { %v3198_v28 = vpop.eup %3197  ;;  %v3892_v30 = vadd.f32 %v292_v26, %v228_v25 }
 0x1ea   :  { %329 = vrot.lane.b32.xlu1 %v3198_v28, %s3676_s14  ;;  %v3200_v32 = vpop.eup %3199 }
 0x1eb   :  { %3207 = vtanh.f32 %v3892_v30 }
 0x1ed   :  { %v3202_v35 = vpop.eup %3201 }
 0x1ee   :  { %333 = vrot.lane.b32.xlu0 %v3202_v35, %s3676_s14  ;;  %331 = vrot.lane.b32.xlu1 %v3200_v32, %s3676_s14 }
 0x1f1   :  { %v3204_v36 = vpop.eup %3203 }
 0x1f2   :  { %v3206_v37 = vpop.eup %3205  ;;  %335 = vrot.lane.b32.xlu1 %v3204_v36, %s3676_s14 }
 0x1f3   :  { %337 = vrot.lane.b32.xlu0 %v3206_v37, %s3676_s14 }
 0x1f5   :  { %v3208_v40 = vpop.eup %3207 }
 0x1f6   :  { %339 = vrot.lane.b32.xlu1 %v3208_v40, %s3676_s14 }
 0x253   :  { %v326_v41 = vpop.permute.xlu0 %325 }
 0x254   :  { %v3910_v51 = vmul.f32 %v3829_v63, %v326_v41 }
 0x258   :  { %v328_v42 = vpop.permute.xlu0 %327 }
 0x259   :  { %v3902_v43 = vmul.f32 %v3837_v24, %v328_v42 }
 0x25b   :  { %v365_v47 = vrot.slane %v3902_v43, 7 }
 0x25c   :  { %v330_v45 = vpop.permute.xlu1 %329 }
 0x25d   :  { %v3905_v46 = vmul.f32 %v3841_v29, %v330_v45  ;;  %v367_v29 = vsel %vm366_vm2, %v365_v47, %v3910_v51 }
 0x25f   :  { %v368_v48 = vrot.slane %v3905_v46, 6 }
 0x260   :  { %v334_v49 = vpop.permute.xlu0 %333  ;;  %v332_v50 = vpop.permute.xlu1 %331 }
 0x261   :  { %v3913_v52 = vmul.f32 %v3833_v8, %v332_v50  ;;  %v3916_v24 = vmul.f32 %v3845_v33, %v334_v49  ;;  %v370_v55 = vsel %vm369_vm3, %v368_v48, %v367_v29 }
 0x263   :  { %v371_v53 = vrot.slane %v3913_v52, 5  ;;  %v374_v8 = vrot.slane %v3916_v24, 4 }
 0x264   :  { %v336_v56 = vpop.permute.xlu1 %335 }
 0x265   :  { %v373_v57 = vsel %vm372_vm4, %v371_v53, %v370_v55  ;;  %v338_v63 = vpop.permute.xlu0 %337  ;;  %v3924_v58 = vmul.f32 %v3848_v38, %v336_v56 }
 0x266   :  { %v3928_v33 = vmul.f32 %v3851_v39, %v338_v63  ;;  %v376_v62 = vsel %vm375_vm5, %v374_v8, %v373_v57 }
 0x267   :  { %v377_v59 = vrot.slane %v3924_v58, 3 }
 0x268   :  { %v340_v61 = vpop.permute.xlu1 %339  ;;  %v380_v38 = vrot.slane %v3928_v33, 2 }
 0x269   :  { %v3933_v1 = vmul.f32 %v3857_v44, %v340_v61  ;;  %v379_v2 = vsel %vm378_vm6, %v377_v59, %v376_v62 }
 0x26a   :  { %v382_v39 = vsel %vm381_vm7, %v380_v38, %v379_v2 }
 0x26b   :  { %v383_v10 = vrot.slane %v3933_v1, 1 }
 0x26d   :  { %v385_v12 = vsel %vm384_vm8, %v383_v10, %v382_v39 }
 0x26e   :  { %386 = vrot.lane.b32.xlu0 %v385_v12, %s3677_s21 }
 0x2e0   :  { %v387_v14 = vpop.permute.xlu0 %386 }
 0x2e1   :  { %3023 = vmatmul.mubr.msk.f32.vlgmr.msra.gmra.mrb[0].mxu1 %vm18_vm0, %v387_v14 }
 0x2e2   :  { %3111 = vmatpush3.bf16.msra.mxu1 %v3721_v5  ;;  %3044 = vmatprep.mubr.msk.f32.mxu1 %vm3674_vm1, %v3675_v4 }
 0x2e3   :  { %3112 = vmatprep.subr.bf16.mxu1 %v3673_v0 }
 0x2e6   :  { %3114 = vmatpush3.bf16.msra.mxu1 %v3730_v7 }
 0x2e7   :  { %3121 = vmatprep.subr.bf16.mxu1 %v3673_v0 }
 0x3b4   :  { %v456_v44 = vpop.f32.mrb[0].mxu1 }
 0x3b5   :  { %v3024_v15 = vpop.f32.mrb[1].mxu1  ;;  %v462_v16 = vrot.slane %v456_v44, 1  ;;  %v461_v18 = vrot.slane %v456_v44, 7  ;;  %v477_v20 = vadd.f32 %v456_v44, %v3782_v22  ;;  %v463_v25 = vrot.slane %v456_v44, 2 }
 0x3b6   :  { %v464_v28 = vrot.slane %v456_v44, 3  ;;  %v465_v35 = vrot.slane %v456_v44, 4  ;;  %v466_v37 = vrot.slane %v456_v44, 5  ;;  %v467_v41 = vrot.slane %v456_v44, 6 }
 0x3b7   :  { %v478_v26 = vadd.f32 %v462_v16, %v3792_v27  ;;  %v476_v32 = vadd.f32 %v461_v18, %v3757_v9  ;;  %3209 = vtanh.f32 %v477_v20  ;;  %v479_v36 = vadd.f32 %v463_v25, %v3762_v11 }
 0x3b8   :  { %v480_v40 = vadd.f32 %v464_v28, %v3800_v31  ;;  %v481_v42 = vadd.f32 %v465_v35, %v3769_v17  ;;  %v482_v45 = vadd.f32 %v466_v37, %v3807_v34  ;;  %v483_v47 = vadd.f32 %v467_v41, %v3774_v19 }
 0x3b9   :  { %3211 = vtanh.f32 %v478_v26  ;;  %v2902_v63 = vmul.f32 -1.442695, %v477_v20  ;;  %v2903_v8 = vmul.f32 -1.442695, %v478_v26  ;;  %v2901_v59 = vmul.f32 -1.442695, %v476_v32 }
 0x3ba   :  { %3213 = vtanh.f32 %v476_v32  ;;  %v2904_v61 = vmul.f32 -1.442695, %v479_v36  ;;  %v2905_v62 = vmul.f32 -1.442695, %v480_v40  ;;  %v2906_v2 = vmul.f32 -1.442695, %v481_v42 }
 0x3bb   :  { %3215 = vtanh.f32 %v479_v36  ;;  %v2907_v38 = vmul.f32 -1.442695, %v482_v45  ;;  %v2908_v10 = vmul.f32 -1.442695, %v483_v47 }
 0x3bc   :  { %3217 = vtanh.f32 %v480_v40 }
 0x3bd   :  { %3219 = vtanh.f32 %v481_v42 }
 0x3be   :  { %3221 = vtanh.f32 %v482_v45 }
 0x3bf   :  { %3223 = vtanh.f32 %v483_v47 }
 0x3c0   :  { %3225 = vpow2.f32 %v2902_v63 }
 0x3c1   :  { %v3210_v48 = vpop.eup %3209  ;;  %3227 = vpow2.f32 %v2903_v8 }
 0x3c2   :  { %582 = vrot.lane.b32.xlu1 %v3210_v48, %s3676_s14  ;;  %3229 = vpow2.f32 %v2901_v59 }
 0x3c3   :  { %v3212_v49 = vpop.eup %3211  ;;  %3231 = vpow2.f32 %v2904_v61 }
 0x3c4   :  { %584 = vrot.lane.b32.xlu0 %v3212_v49, %s3676_s14  ;;  %v3214_v50 = vpop.eup %3213  ;;  %3233 = vpow2.f32 %v2905_v62 }
 0x3c5   :  { %v3216_v29 = vpop.eup %3215  ;;  %3235 = vpow2.f32 %v2906_v2 }
 0x3c6   :  { %580 = vrot.lane.b32.xlu1 %v3214_v50, %s3676_s14  ;;  %v3218_v53 = vpop.eup %3217  ;;  %3237 = vpow2.f32 %v2907_v38 }
 0x3c7   :  { %v3220_v55 = vpop.eup %3219  ;;  %3239 = vpow2.f32 %v2908_v10 }
 0x3c8   :  { %586 = vrot.lane.b32.xlu0 %v3216_v29, %s3676_s14  ;;  %v3222_v56 = vpop.eup %3221 }
 0x3c9   :  { %v3224_v57 = vpop.eup %3223 }
 0x3ca   :  { %588 = vrot.lane.b32.xlu1 %v3218_v53, %s3676_s14  ;;  %v3226_v39 = vpop.eup %3225 }
 0x3cb   :  { %v3228_v12 = vpop.eup %3227  ;;  %v509_v14 = vadd.f32 1.0, %v3226_v39 }
 0x3cc   :  { %590 = vrot.lane.b32.xlu0 %v3220_v55, %s3676_s14  ;;  %v3230_v44 = vpop.eup %3229  ;;  %v510_v15 = vadd.f32 1.0, %v3228_v12 }
 0x3cd   :  { %v3232_v16 = vpop.eup %3231  ;;  %3241 = vrcp.f32 %v509_v14  ;;  %v508_v18 = vadd.f32 1.0, %v3230_v44 }
 0x3ce   :  { %592 = vrot.lane.b32.xlu1 %v3222_v56, %s3676_s14  ;;  %v3234_v20 = vpop.eup %3233  ;;  %3243 = vrcp.f32 %v510_v15  ;;  %v511_v25 = vadd.f32 1.0, %v3232_v16  ;;  %v549_v15 = vrot.slane %v3867_v60, 7  ;;  %v550_v16 = vrot.slane %v3872_v3, 7 }
 0x3cf   :  { %v3236_v26 = vpop.eup %3235  ;;  %3245 = vrcp.f32 %v508_v18  ;;  %v512_v28 = vadd.f32 1.0, %v3234_v20 }
 0x3d0   :  { %594 = vrot.lane.b32.xlu0 %v3224_v57, %s3676_s14  ;;  %v3238_v32 = vpop.eup %3237  ;;  %3247 = vrcp.f32 %v511_v25  ;;  %v513_v35 = vadd.f32 1.0, %v3236_v26  ;;  %v548_v26 = vrot.slane %v3862_v54, 7 }
 0x3d1   :  { %v3240_v36 = vpop.eup %3239  ;;  %3249 = vrcp.f32 %v512_v28  ;;  %v514_v37 = vadd.f32 1.0, %v3238_v32 }
 0x3d2   :  { %3251 = vrcp.f32 %v513_v35  ;;  %v515_v40 = vadd.f32 1.0, %v3240_v36  ;;  %v551_v35 = vrot.slane %v3874_v6, 7 }
 0x3d3   :  { %3253 = vrcp.f32 %v514_v37 }
 0x3d4   :  { %3255 = vrcp.f32 %v515_v40  ;;  %v552_v40 = vrot.slane %v3878_v13, 7 }
 0x3d7   :  { %v3964_v41 = vpop.eup %3241 }
 0x3d8   :  { %v3966_v45 = vpop.eup %3243  ;;  %v565_v18 = vmul.f32 %v3964_v41, %v549_v15 }
 0x3d9   :  { %v3971_v50 = vpop.eup %3245  ;;  %v566_v25 = vmul.f32 %v3966_v45, %v550_v16 }
 0x3da   :  { %v3974_v53 = vpop.eup %3247  ;;  %v564_v60 = vmul.f32 %v3971_v50, %v548_v26 }
 0x3db   :  { %v3979_v63 = vpop.eup %3249  ;;  %v567_v37 = vmul.f32 %v3974_v53, %v551_v35 }
 0x3dc   :  { %v3982_v59 = vpop.eup %3251  ;;  %v568_v6 = vmul.f32 %v3979_v63, %v552_v40 }
 0x3dd   :  { %v3987_v38 = vpop.eup %3253 }
 0x3de   :  { %v3990_v39 = vpop.eup %3255 }
 0x434   :  { %v583_v42 = vpop.permute.xlu1 %582 }
 0x435   :  { %v605_v47 = vmul.f32 %v3964_v41, %v583_v42 }
 0x436   :  { %v585_v48 = vpop.permute.xlu0 %584 }
 0x437   :  { %v606_v49 = vmul.f32 %v3966_v45, %v585_v48  ;;  %622 = vrot.lane.b32.xlu1 %v605_v47, %s3677_s21  ;;  %v553_v47 = vrot.slane %v3884_v21, 7 }
 0x438   :  { %v581_v29 = vpop.permute.xlu1 %580 }
 0x439   :  { %624 = vrot.lane.b32.xlu0 %v606_v49, %s3677_s21  ;;  %v604_v55 = vmul.f32 %v3971_v50, %v581_v29  ;;  %v569_v29 = vmul.f32 %v3982_v59, %v553_v47 }
 0x43a   :  { %v587_v56 = vpop.permute.xlu0 %586 }
 0x43b   :  { %v607_v57 = vmul.f32 %v3974_v53, %v587_v56  ;;  %620 = vrot.lane.b32.xlu1 %v604_v55, %s3677_s21  ;;  %v554_v55 = vrot.slane %v3886_v23, 7 }
 0x43c   :  { %v589_v8 = vpop.permute.xlu1 %588 }
 0x43d   :  { %626 = vrot.lane.b32.xlu0 %v607_v57, %s3677_s21  ;;  %v608_v61 = vmul.f32 %v3979_v63, %v589_v8  ;;  %v555_v57 = vrot.slane %v3892_v30, 7  ;;  %v570_v21 = vmul.f32 %v3987_v38, %v554_v55 }
 0x43e   :  { %v591_v62 = vpop.permute.xlu0 %590 }
 0x43f   :  { %v609_v2 = vmul.f32 %v3982_v59, %v591_v62  ;;  %628 = vrot.lane.b32.xlu1 %v608_v61, %s3677_s21  ;;  %v571_v62 = vmul.f32 %v3990_v39, %v555_v57 }
 0x440   :  { %v593_v10 = vpop.permute.xlu1 %592 }
 0x441   :  { %630 = vrot.lane.b32.xlu0 %v609_v2, %s3677_s21  ;;  %v610_v12 = vmul.f32 %v3987_v38, %v593_v10 }
 0x442   :  { %v595_v14 = vpop.permute.xlu0 %594 }
 0x443   :  { %v611_v44 = vmul.f32 %v3990_v39, %v595_v14  ;;  %632 = vrot.lane.b32.xlu1 %v610_v12, %s3677_s21 }
 0x445   :  { %634 = vrot.lane.b32.xlu0 %v611_v44, %s3677_s21 }
 0x4a9   :  { %v623_v20 = vpop.permute.xlu1 %622 }
 0x4aa   :  { %v4001_v28 = vadd.f32 %v623_v20, %v565_v18 }
 0x4ab   :  { %v625_v32 = vpop.permute.xlu0 %624 }
 0x4ac   :  { %v4004_v36 = vadd.f32 %v625_v32, %v566_v25  ;;  %3257 = vtanh.f32 %v4001_v28 }
 0x4ad   :  { %v621_v3 = vpop.permute.xlu1 %620 }
 0x4ae   :  { %3259 = vtanh.f32 %v4004_v36  ;;  %v4011_v42 = vadd.f32 %v621_v3, %v564_v60 }
 0x4af   :  { %v627_v54 = vpop.permute.xlu0 %626 }
 0x4b0   :  { %v4014_v48 = vadd.f32 %v627_v54, %v567_v37  ;;  %3261 = vtanh.f32 %v4011_v42 }
 0x4b1   :  { %v629_v49 = vpop.permute.xlu1 %628 }
 0x4b2   :  { %3263 = vtanh.f32 %v4014_v48  ;;  %v4021_v56 = vadd.f32 %v629_v49, %v568_v6 }
 0x4b3   :  { %v631_v13 = vpop.permute.xlu0 %630 }
 0x4b4   :  { %v4024_v8 = vadd.f32 %v631_v13, %v569_v29  ;;  %3265 = vtanh.f32 %v4021_v56 }
 0x4b5   :  { %v633_v61 = vpop.permute.xlu1 %632 }
 0x4b6   :  { %3267 = vtanh.f32 %v4024_v8  ;;  %v3258_v2 = vpop.eup %3257  ;;  %v4030_v10 = vadd.f32 %v633_v61, %v570_v21 }
 0x4b7   :  { %v635_v23 = vpop.permute.xlu0 %634  ;;  %670 = vrot.lane.b32.xlu1 %v3258_v2, %s3676_s14 }
 0x4b8   :  { %v3260_v12 = vpop.eup %3259  ;;  %v4032_v14 = vadd.f32 %v635_v23, %v571_v62  ;;  %3269 = vtanh.f32 %v4030_v10 }
 0x4b9   :  { %672 = vrot.lane.b32.xlu0 %v3260_v12, %s3676_s14 }
 0x4ba   :  { %3271 = vtanh.f32 %v4032_v14  ;;  %v3262_v30 = vpop.eup %3261 }
 0x4bb   :  { %668 = vrot.lane.b32.xlu1 %v3262_v30, %s3676_s14 }
 0x4bc   :  { %v3264_v44 = vpop.eup %3263 }
 0x4bd   :  { %674 = vrot.lane.b32.xlu0 %v3264_v44, %s3676_s14 }
 0x4be   :  { %v3266_v15 = vpop.eup %3265 }
 0x4bf   :  { %676 = vrot.lane.b32.xlu1 %v3266_v15, %s3676_s14 }
 0x4c0   :  { %v3268_v16 = vpop.eup %3267 }
 0x4c1   :  { %678 = vrot.lane.b32.xlu0 %v3268_v16, %s3676_s14 }
 0x4c2   :  { %v3270_v18 = vpop.eup %3269 }
 0x4c3   :  { %680 = vrot.lane.b32.xlu1 %v3270_v18, %s3676_s14 }
 0x4c4   :  { %v3272_v20 = vpop.eup %3271 }
 0x4c5   :  { %682 = vrot.lane.b32.xlu0 %v3272_v20, %s3676_s14 }
 0x529   :  { %v671_v25 = vpop.permute.xlu1 %670 }
 0x52a   :  { %v4054_v40 = vmul.f32 %v3964_v41, %v671_v25 }
 0x52b   :  { %v673_v26 = vpop.permute.xlu0 %672 }
 0x52c   :  { %v4045_v32 = vmul.f32 %v3966_v45, %v673_v26 }
 0x52d   :  { %v669_v35 = vpop.permute.xlu1 %668 }
 0x52e   :  { %v4048_v60 = vmul.f32 %v3971_v50, %v669_v35  ;;  %v710_v47 = vrot.slane %v4045_v32, 7 }
 0x52f   :  { %v675_v3 = vpop.permute.xlu0 %674 }
 0x530   :  { %v4051_v37 = vmul.f32 %v3974_v53, %v675_v3  ;;  %v708_v54 = vrot.slane %v4048_v60, 1 }
 0x531   :  { %v677_v49 = vpop.permute.xlu1 %676 }
 0x532   :  { %v712_v6 = vrot.slane %v4051_v37, 6  ;;  %v709_v45 = vsel %vm366_vm2, %v4054_v40, %v708_v54  ;;  %v4062_v50 = vmul.f32 %v3979_v63, %v677_v49 }
 0x533   :  { %v679_v29 = vpop.permute.xlu0 %678  ;;  %v711_v53 = vsel %vm369_vm3, %v710_v47, %v709_v45 }
 0x534   :  { %v4066_v55 = vmul.f32 %v3982_v59, %v679_v29  ;;  %v713_v41 = vsel %vm372_vm4, %v712_v6, %v711_v53  ;;  %v714_v13 = vrot.slane %v4062_v50, 5 }
 0x535   :  { %v681_v21 = vpop.permute.xlu1 %680 }
 0x536   :  { %v716_v57 = vrot.slane %v4066_v55, 4  ;;  %v715_v61 = vsel %vm375_vm5, %v714_v13, %v713_v41  ;;  %v4073_v62 = vmul.f32 %v3987_v38, %v681_v21 }
 0x537   :  { %v683_v63 = vpop.permute.xlu0 %682 }
 0x538   :  { %v4076_v2 = vmul.f32 %v3990_v39, %v683_v63  ;;  %v717_v23 = vsel %vm378_vm6, %v716_v57, %v715_v61  ;;  %v718_v59 = vrot.slane %v4073_v62, 3 }
 0x53a   :  { %v720_v12 = vrot.slane %v4076_v2, 2  ;;  %v719_v30 = vsel %vm381_vm7, %v718_v59, %v717_v23 }
 0x53c   :  { %v721_v44 = vsel %vm384_vm8, %v720_v12, %v719_v30 }
 0x53d   :  { %722 = vrot.lane.b32.xlu1 %v721_v44, %s3677_s21 }
 0x5af   :  { %v723_v15 = vpop.permute.xlu1 %722 }
 0x5b0   :  { %3034 = vmatmul.mubr.msk.f32.vlgmr.msra.gmra.mrb[2].mxu0 %vm18_vm0, %v723_v15 }
 0x5b1   :  { %3117 = vmatpush3.bf16.msra.mxu0 %v3721_v5  ;;  %3055 = vmatprep.mubr.msk.f32.mxu0 %vm3674_vm1, %v3675_v4 }
 0x5b2   :  { %3118 = vmatprep.subr.bf16.mxu0 %v3673_v0 }
 0x5b5   :  { %3120 = vmatpush3.bf16.msra.mxu0 %v3730_v7 }
 0x5b6   :  { %3127 = vmatprep.subr.bf16.mxu0 %v3673_v0 }
 0x683   :  { %v792_v38 = vpop.f32.mrb[2].mxu0 }
 0x684   :  { %v797_v39 = vrot.slane %v792_v38, 6  ;;  %v3035_v16 = vpop.f32.mrb[3].mxu0  ;;  %v799_v20 = vrot.slane %v792_v38, 1  ;;  %v798_v25 = vrot.slane %v792_v38, 7  ;;  %v814_v26 = vadd.f32 %v792_v38, %v3792_v27 }
 0x685   :  { %v800_v35 = vrot.slane %v792_v38, 2  ;;  %v801_v47 = vrot.slane %v792_v38, 3  ;;  %v802_v49 = vrot.slane %v792_v38, 4 }
 0x686   :  { %v812_v18 = vadd.f32 %v797_v39, %v3757_v9  ;;  %v815_v3 = vadd.f32 %v799_v20, %v3762_v11  ;;  %v813_v6 = vadd.f32 %v798_v25, %v3782_v22  ;;  %v803_v9 = vrot.slane %v792_v38, 5 }
 0x687   :  { %v816_v45 = vadd.f32 %v800_v35, %v3800_v31  ;;  %v817_v29 = vadd.f32 %v801_v47, %v3769_v17  ;;  %v818_v27 = vadd.f32 %v802_v49, %v3807_v34  ;;  %v2912_v57 = vmul.f32 -1.442695, %v814_v26 }
 0x688   :  { %3273 = vtanh.f32 %v812_v18  ;;  %v819_v11 = vadd.f32 %v803_v9, %v3774_v19  ;;  %v2910_v13 = vmul.f32 -1.442695, %v812_v18  ;;  %v2913_v21 = vmul.f32 -1.442695, %v815_v3 }
 0x689   :  { %3275 = vtanh.f32 %v814_v26  ;;  %v2911_v63 = vmul.f32 -1.442695, %v813_v6  ;;  %v2914_v23 = vmul.f32 -1.442695, %v816_v45  ;;  %v2915_v12 = vmul.f32 -1.442695, %v817_v29 }
 0x68a   :  { %3277 = vtanh.f32 %v815_v3  ;;  %v2916_v30 = vmul.f32 -1.442695, %v818_v27  ;;  %v2917_v44 = vmul.f32 -1.442695, %v819_v11 }
 0x68b   :  { %3279 = vtanh.f32 %v813_v6 }
 0x68c   :  { %3281 = vtanh.f32 %v816_v45 }
 0x68d   :  { %3283 = vtanh.f32 %v817_v29 }
 0x68e   :  { %3285 = vtanh.f32 %v818_v27 }
 0x68f   :  { %3287 = vtanh.f32 %v819_v11 }
 0x690   :  { %3289 = vpow2.f32 %v2910_v13 }
 0x691   :  { %3291 = vpow2.f32 %v2912_v57 }
 0x692   :  { %v3274_v54 = vpop.eup %3273  ;;  %3293 = vpow2.f32 %v2913_v21 }
 0x693   :  { %916 = vrot.lane.b32.xlu0 %v3274_v54, %s3676_s14  ;;  %v3276_v53 = vpop.eup %3275  ;;  %3295 = vpow2.f32 %v2911_v63 }
 0x694   :  { %v3278_v22 = vpop.eup %3277  ;;  %920 = vrot.lane.b32.xlu1 %v3276_v53, %s3676_s14  ;;  %3297 = vpow2.f32 %v2914_v23 }
 0x695   :  { %v3280_v31 = vpop.eup %3279 }
 0x696   :  { %v3282_v41 = vpop.eup %3281 }
 0x697   :  { %922 = vrot.lane.b32.xlu0 %v3278_v22, %s3676_s14  ;;  %v3284_v17 = vpop.eup %3283 }
 0x698   :  { %918 = vrot.lane.b32.xlu1 %v3280_v31, %s3676_s14  ;;  %v3286_v34 = vpop.eup %3285 }
 0x699   :  { %v3288_v19 = vpop.eup %3287 }
 0x69a   :  { %v3290_v61 = vpop.eup %3289 }
 0x69b   :  { %924 = vrot.lane.b32.xlu0 %v3282_v41, %s3676_s14  ;;  %v844_v59 = vadd.f32 1.0, %v3290_v61  ;;  %v3292_v15 = vpop.eup %3291 }
 0x69c   :  { %926 = vrot.lane.b32.xlu1 %v3284_v17, %s3676_s14  ;;  %v3294_v38 = vpop.eup %3293  ;;  %v846_v39 = vadd.f32 1.0, %v3292_v15 }
 0x69d   :  { %3299 = vrcp.f32 %v844_v59  ;;  %v3296_v16 = vpop.eup %3295  ;;  %v847_v18 = vadd.f32 1.0, %v3294_v38 }
 0x69e   :  { %3301 = vpow2.f32 %v2915_v12  ;;  %v3298_v20 = vpop.eup %3297  ;;  %v845_v35 = vadd.f32 1.0, %v3296_v16 }
 0x69f   :  { %928 = vrot.lane.b32.xlu0 %v3286_v34, %s3676_s14  ;;  %3303 = vpow2.f32 %v2916_v30  ;;  %v848_v47 = vadd.f32 1.0, %v3298_v20 }
 0x6a0   :  { %930 = vrot.lane.b32.xlu1 %v3288_v19, %s3676_s14  ;;  %3305 = vpow2.f32 %v2917_v44 }
 0x6a1   :  { %3307 = vrcp.f32 %v846_v39  ;;  %v884_v39 = vrot.slane %v4011_v42, 7 }
 0x6a2   :  { %3309 = vrcp.f32 %v847_v18 }
 0x6a3   :  { %3311 = vrcp.f32 %v845_v35  ;;  %v887_v35 = vrot.slane %v4014_v48, 7 }
 0x6a4   :  { %3313 = vrcp.f32 %v848_v47 }
 0x6a7   :  { %v4107_v25 = vpop.eup %3299 }
 0x6a8   :  { %v3302_v3 = vpop.eup %3301  ;;  %v900_v16 = vmul.f32 %v4107_v25, %v884_v39 }
 0x6a9   :  { %v3304_v6 = vpop.eup %3303  ;;  %v849_v49 = vadd.f32 1.0, %v3302_v3 }
 0x6aa   :  { %v3306_v45 = vpop.eup %3305  ;;  %v850_v9 = vadd.f32 1.0, %v3304_v6  ;;  %v885_v6 = vrot.slane %v4001_v28, 7  ;;  %v889_v28 = vrot.slane %v4024_v8, 7 }
 0x6ab   :  { %3315 = vrcp.f32 %v849_v49  ;;  %v851_v29 = vadd.f32 1.0, %v3306_v45  ;;  %v4111_v27 = vpop.eup %3307  ;;  %v888_v45 = vrot.slane %v4021_v56, 7  ;;  %v890_v56 = vrot.slane %v4030_v10, 7 }
 0x6ac   :  { %3317 = vrcp.f32 %v850_v9  ;;  %v4113_v53 = vpop.eup %3309 }
 0x6ad   :  { %3319 = vrcp.f32 %v851_v29  ;;  %v4118_v17 = vpop.eup %3311  ;;  %v903_v47 = vmul.f32 %v4113_v53, %v887_v35 }
 0x6ae   :  { %v4121_v19 = vpop.eup %3313 }
 0x6b5   :  { %v4126_v61 = vpop.eup %3315 }
 0x6b6   :  { %v4129_v23 = vpop.eup %3317 }
 0x6b7   :  { %v4134_v44 = vpop.eup %3319 }
 0x705   :  { %v917_v26 = vpop.permute.xlu0 %916 }
 0x706   :  { %v940_v54 = vmul.f32 %v4107_v25, %v917_v26  ;;  %v921_v11 = vpop.permute.xlu1 %920  ;;  %v886_v26 = vrot.slane %v4004_v36, 7  ;;  %v901_v36 = vmul.f32 %v4118_v17, %v885_v6 }
 0x707   :  { %v942_v22 = vmul.f32 %v4111_v27, %v921_v11  ;;  %v904_v11 = vmul.f32 %v4121_v19, %v888_v45 }
 0x708   :  { %956 = vrot.lane.b32.xlu0 %v940_v54, %s3677_s21  ;;  %v902_v3 = vmul.f32 %v4111_v27, %v886_v26 }
 0x709   :  { %v923_v31 = vpop.permute.xlu0 %922  ;;  %960 = vrot.lane.b32.xlu1 %v942_v22, %s3677_s21 }
 0x70a   :  { %v943_v41 = vmul.f32 %v4113_v53, %v923_v31  ;;  %v919_v34 = vpop.permute.xlu1 %918 }
 0x70b   :  { %v941_v13 = vmul.f32 %v4118_v17, %v919_v34  ;;  %v905_v34 = vmul.f32 %v4126_v61, %v889_v28 }
 0x70c   :  { %962 = vrot.lane.b32.xlu0 %v943_v41, %s3677_s21 }
 0x70d   :  { %v925_v57 = vpop.permute.xlu0 %924  ;;  %958 = vrot.lane.b32.xlu1 %v941_v13, %s3677_s21 }
 0x70e   :  { %v944_v21 = vmul.f32 %v4121_v19, %v925_v57  ;;  %v927_v63 = vpop.permute.xlu1 %926  ;;  %v906_v57 = vmul.f32 %v4129_v23, %v890_v56 }
 0x70f   :  { %v945_v59 = vmul.f32 %v4126_v61, %v927_v63 }
 0x710   :  { %964 = vrot.lane.b32.xlu0 %v944_v21, %s3677_s21  ;;  %v891_v21 = vrot.slane %v4032_v14, 7 }
 0x711   :  { %v929_v12 = vpop.permute.xlu0 %928  ;;  %966 = vrot.lane.b32.xlu1 %v945_v59, %s3677_s21 }
 0x712   :  { %v946_v30 = vmul.f32 %v4129_v23, %v929_v12  ;;  %v931_v15 = vpop.permute.xlu1 %930  ;;  %v907_v10 = vmul.f32 %v4134_v44, %v891_v21 }
 0x713   :  { %v947_v38 = vmul.f32 %v4134_v44, %v931_v15 }
 0x714   :  { %968 = vrot.lane.b32.xlu0 %v946_v30, %s3677_s21 }
 0x715   :  { %970 = vrot.lane.b32.xlu1 %v947_v38, %s3677_s21 }
 0x77a   :  { %v957_v18 = vpop.permute.xlu0 %956 }
 0x77b   :  { %v4141_v20 = vadd.f32 %v957_v18, %v900_v16  ;;  %v961_v54 = vpop.permute.xlu1 %960 }
 0x77c   :  { %v4149_v49 = vadd.f32 %v961_v54, %v902_v3  ;;  %v2717_v54 = vsel %vm2716_vm9, %v3910_v51, %v4048_v60 }
 0x77d   :  { %3321 = vtanh.f32 %v4141_v20 }
 0x77e   :  { %v963_v42 = vpop.permute.xlu0 %962  ;;  %3323 = vtanh.f32 %v4149_v49 }
 0x77f   :  { %v4152_v9 = vadd.f32 %v963_v42, %v903_v47  ;;  %v959_v48 = vpop.permute.xlu1 %958 }
 0x780   :  { %v4160_v22 = vadd.f32 %v959_v48, %v901_v36 }
 0x781   :  { %3325 = vtanh.f32 %v4152_v9 }
 0x782   :  { %v965_v31 = vpop.permute.xlu0 %964  ;;  %3327 = vtanh.f32 %v4160_v22 }
 0x783   :  { %v4163_v41 = vadd.f32 %v965_v31, %v904_v11  ;;  %v967_v13 = vpop.permute.xlu1 %966 }
 0x784   :  { %v4170_v63 = vadd.f32 %v967_v13, %v905_v34 }
 0x785   :  { %3329 = vtanh.f32 %v4163_v41 }
 0x786   :  { %v969_v8 = vpop.permute.xlu0 %968  ;;  %3331 = vtanh.f32 %v4170_v63 }
 0x787   :  { %v3322_v29 = vpop.eup %3321  ;;  %v4172_v59 = vadd.f32 %v969_v8, %v906_v57  ;;  %v971_v12 = vpop.permute.xlu1 %970  ;;  %v2723_v57 = vsel %vm2716_vm9, %v3928_v33, %v4073_v62  ;;  %v2724_v33 = vsel %vm2716_vm9, %v3933_v1, %v4076_v2 }
 0x788   :  { %1004 = vrot.lane.b32.xlu0 %v3322_v29, %s3676_s14  ;;  %v3324_v30 = vpop.eup %3323  ;;  %v4177_v15 = vadd.f32 %v971_v12, %v907_v10  ;;  %v2719_v29 = vsel %vm2716_vm9, %v3905_v46, %v4045_v32  ;;  %v2718_v46 = vsel %vm2716_vm9, %v3902_v43, %v4054_v40  ;;  %v2721_v32 = vsel %vm2716_vm9, %v3916_v24, %v4062_v50 }
 0x789   :  { %3333 = vtanh.f32 %v4172_v59  ;;  %1008 = vrot.lane.b32.xlu1 %v3324_v30, %s3676_s14  ;;  %v2722_v24 = vsel %vm2716_vm9, %v3924_v58, %v4066_v55 }
 0x78a   :  { %3335 = vtanh.f32 %v4177_v15 }
 0x78b   :  { %v3326_v38 = vpop.eup %3325 }
 0x78c   :  { %1010 = vrot.lane.b32.xlu0 %v3326_v38, %s3676_s14  ;;  %v3328_v14 = vpop.eup %3327 }
 0x78d   :  { %1006 = vrot.lane.b32.xlu1 %v3328_v14, %s3676_s14 }
 0x78f   :  { %v3330_v39 = vpop.eup %3329 }
 0x790   :  { %1012 = vrot.lane.b32.xlu0 %v3330_v39, %s3676_s14  ;;  %v3332_v16 = vpop.eup %3331 }
 0x791   :  { %1014 = vrot.lane.b32.xlu1 %v3332_v16, %s3676_s14 }
 0x793   :  { %v3334_v18 = vpop.eup %3333 }
 0x794   :  { %1016 = vrot.lane.b32.xlu0 %v3334_v18, %s3676_s14  ;;  %v3336_v26 = vpop.eup %3335 }
 0x795   :  { %1018 = vrot.lane.b32.xlu1 %v3336_v26, %s3676_s14  ;;  %v4261_v26 = vld [vmem:[%s5099_s0 + $0x8] sm:$0xff] }
 0x7fa   :  { %v1005_v35 = vpop.permute.xlu0 %1004 }
 0x7fb   :  { %v1028_v3 = vmul.f32 %v4107_v25, %v1005_v35  ;;  %v1009_v6 = vpop.permute.xlu1 %1008  ;;  %v2720_v25 = vsel %vm2716_vm9, %v3913_v52, %v4051_v37 }
 0x7fc   :  { %v1030_v42 = vmul.f32 %v4111_v27, %v1009_v6 }
 0x7fd   :  { %v4192_v47 = vsel %vm2725_vm10, %v2717_v54, %v1028_v3  ;;  %v1044_v37 = vrot.slane %v1028_v3, 2  ;;  %v4267_v54 = vld [vmem:[%s5099_s0 + $0x18] sm:$0xff] }
 0x7fe   :  { %v1011_v45 = vpop.permute.xlu0 %1010  ;;  %v4203_v51 = vsel %vm2725_vm10, %v2719_v29, %v1030_v42 }
 0x7ff   :  { %v1031_v36 = vmul.f32 %v4113_v53, %v1011_v45  ;;  %v1007_v60 = vpop.permute.xlu1 %1006  ;;  %v4273_v45 = vld [vmem:[%s5099_s0 + $0x20] sm:$0xff] }
 0x800   :  { %v1029_v27 = vmul.f32 %v4118_v17, %v1007_v60 }
 0x801   :  { %v4206_v48 = vsel %vm2725_vm10, %v2720_v25, %v1031_v36  ;;  %v1048_v31 = vrot.slane %v1031_v36, 7  ;;  %v4279_v25 = vld [vmem:[%s5099_s0] sm:$0xff] }
 0x802   :  { %v1013_v11 = vpop.permute.xlu0 %1012  ;;  %v1045_v53 = vrot.slane %v1029_v27, 1  ;;  %v4217_v28 = vsel %vm2725_vm10, %v2718_v46, %v1029_v27 }
 0x803   :  { %v1032_v52 = vmul.f32 %v4121_v19, %v1013_v11  ;;  %v1015_v56 = vpop.permute.xlu1 %1014  ;;  %v4285_v11 = vld [vmem:[%s5099_s0 + $0x28] sm:$0xff] }
 0x804   :  { %v1046_v13 = vsel %vm366_vm2, %v1045_v53, %v1044_v37  ;;  %v1033_v43 = vmul.f32 %v4126_v61, %v1015_v56  ;;  %v4297_v53 = vld [vmem:[%s5099_s0 + $0x38] sm:$0xff] }
 0x805   :  { %v1050_v34 = vrot.slane %v1032_v52, 6  ;;  %v4220_v17 = vsel %vm2725_vm10, %v2721_v32, %v1032_v52  ;;  %v1047_v50 = vsel %vm369_vm3, %v1030_v42, %v1046_v13  ;;  %v4291_v52 = vld [vmem:[%s5099_s0 + $0x10] sm:$0xff] }
 0x806   :  { %v1017_v40 = vpop.permute.xlu0 %1016  ;;  %v1049_v21 = vsel %vm372_vm4, %v1048_v31, %v1047_v50  ;;  %v1052_v8 = vrot.slane %v1033_v43, 5  ;;  %v4234_v10 = vsel %vm2725_vm10, %v2722_v24, %v1033_v43 }
 0x807   :  { %v1034_v19 = vmul.f32 %v4129_v23, %v1017_v40  ;;  %v1051_v61 = vsel %vm375_vm5, %v1050_v34, %v1049_v21  ;;  %v1019_v12 = vpop.permute.xlu1 %1018  ;;  %v4303_v34 = vld [vmem:[%s5099_s0 + $0x30] sm:$0xff] }
 0x808   :  { %v1035_v55 = vmul.f32 %v4134_v44, %v1019_v12  ;;  %v1053_v23 = vsel %vm378_vm6, %v1052_v8, %v1051_v61 }
 0x809   :  { %v1054_v30 = vrot.slane %v1034_v19, 4  ;;  %v4238_v58 = vsel %vm2725_vm10, %v2723_v57, %v1034_v19 }
 0x80a   :  { %v1056_v38 = vrot.slane %v1035_v55, 3  ;;  %v4247_v14 = vsel %vm2725_vm10, %v2724_v33, %v1035_v55 }
 0x80b   :  { %v1055_v62 = vsel %vm381_vm7, %v1054_v30, %v1053_v23 }
 0x80c   :  { %v1057_v39 = vsel %vm384_vm8, %v1056_v38, %v1055_v62 }
 0x80d   :  { %1058 = vrot.lane.b32.xlu0 %v1057_v39, %s3677_s21 }
 0x87f   :  { %v1059_v16 = vpop.permute.xlu0 %1058 }
 0x880   :  { %3045 = vmatmul.mubr.msk.f32.vlgmr.msra.gmra.mrb[2].mxu1 %vm18_vm0, %v1059_v16 }
 0x881   :  { %3123 = vmatpush3.bf16.msra.mxu1 %v3721_v5  ;;  %3066 = vmatprep.mubr.msk.f32.mxu1 %vm3674_vm1, %v3675_v4 }
 0x882   :  { %3124 = vmatprep.subr.bf16.mxu1 %v3673_v0 }
 0x885   :  { %3126 = vmatpush3.bf16.msra.mxu1 %v3730_v7 }
 0x886   :  { %3133 = vmatprep.subr.bf16.mxu1 %v3673_v0 }
 0x953   :  { %v1128_v1 = vpop.f32.mrb[2].mxu1 }
 0x954   :  { %v3046_v2 = vpop.f32.mrb[3].mxu1  ;;  %v1134_v44 = vrot.slane %v1128_v1, 6  ;;  %v1136_v18 = vrot.slane %v1128_v1, 1  ;;  %v1133_v3 = vrot.slane %v1128_v1, 5  ;;  %v1151_v6 = vadd.f32 %v4267_v54, %v1128_v1 }
 0x955   :  { %v1137_v42 = vrot.slane %v1128_v1, 2  ;;  %v1135_v36 = vrot.slane %v1128_v1, 7  ;;  %v1139_v27 = vrot.slane %v1128_v1, 4  ;;  %v1138_v32 = vrot.slane %v1128_v1, 3 }
 0x956   :  { %v1149_v35 = vadd.f32 %v4261_v26, %v1134_v44  ;;  %v1152_v29 = vadd.f32 %v4273_v45, %v1136_v18  ;;  %v1148_v60 = vadd.f32 %v4279_v25, %v1133_v3  ;;  %v2922_v61 = vmul.f32 -1.442695, %v1151_v6 }
 0x957   :  { %v1153_v46 = vadd.f32 %v4285_v11, %v1137_v42  ;;  %v1150_v37 = vadd.f32 %v4291_v52, %v1135_v36  ;;  %v1155_v31 = vadd.f32 %v4297_v53, %v1139_v27  ;;  %v1154_v13 = vadd.f32 %v4303_v34, %v1138_v32 }
 0x958   :  { %3337 = vtanh.f32 %v1149_v35  ;;  %v2920_v8 = vmul.f32 -1.442695, %v1149_v35  ;;  %v2923_v12 = vmul.f32 -1.442695, %v1152_v29  ;;  %v2919_v30 = vmul.f32 -1.442695, %v1148_v60 }
 0x959   :  { %3339 = vtanh.f32 %v1151_v6  ;;  %v2924_v55 = vmul.f32 -1.442695, %v1153_v46  ;;  %v2921_v23 = vmul.f32 -1.442695, %v1150_v37  ;;  %v2926_v33 = vmul.f32 -1.442695, %v1155_v31 }
 0x95a   :  { %3341 = vtanh.f32 %v1152_v29  ;;  %v2925_v38 = vmul.f32 -1.442695, %v1154_v13 }
 0x95b   :  { %3343 = vtanh.f32 %v1148_v60 }
 0x95c   :  { %3345 = vtanh.f32 %v1153_v46 }
 0x95d   :  { %3347 = vtanh.f32 %v1150_v37 }
 0x95e   :  { %3349 = vtanh.f32 %v1155_v31 }
 0x95f   :  { %3351 = vtanh.f32 %v1154_v13 }
 0x960   :  { %3353 = vpow2.f32 %v2920_v8 }
 0x961   :  { %3355 = vpow2.f32 %v2922_v61 }
 0x962   :  { %v3338_v56 = vpop.eup %3337  ;;  %3357 = vpow2.f32 %v2923_v12 }
 0x963   :  { %1254 = vrot.lane.b32.xlu0 %v3338_v56, %s3676_s14  ;;  %v3340_v43 = vpop.eup %3339  ;;  %3359 = vpow2.f32 %v2919_v30 }
 0x964   :  { %1258 = vrot.lane.b32.xlu1 %v3340_v43, %s3676_s14  ;;  %v3342_v40 = vpop.eup %3341  ;;  %3361 = vpow2.f32 %v2924_v55 }
 0x965   :  { %v3344_v24 = vpop.eup %3343  ;;  %3363 = vpow2.f32 %v2921_v23 }
 0x966   :  { %v3346_v50 = vpop.eup %3345  ;;  %3365 = vpow2.f32 %v2926_v33 }
 0x967   :  { %1260 = vrot.lane.b32.xlu0 %v3342_v40, %s3676_s14  ;;  %v3348_v19 = vpop.eup %3347  ;;  %3367 = vpow2.f32 %v2925_v38 }
 0x968   :  { %1252 = vrot.lane.b32.xlu1 %v3344_v24, %s3676_s14  ;;  %v3350_v57 = vpop.eup %3349 }
 0x969   :  { %v3352_v21 = vpop.eup %3351 }
 0x96a   :  { %v3354_v62 = vpop.eup %3353 }
 0x96b   :  { %1262 = vrot.lane.b32.xlu0 %v3346_v50, %s3676_s14  ;;  %v3356_v39 = vpop.eup %3355  ;;  %v1181_v16 = vadd.f32 1.0, %v3354_v62 }
 0x96c   :  { %1256 = vrot.lane.b32.xlu1 %v3348_v19, %s3676_s14  ;;  %v3358_v1 = vpop.eup %3357  ;;  %v1183_v2 = vadd.f32 1.0, %v3356_v39 }
 0x96d   :  { %v3360_v44 = vpop.eup %3359  ;;  %3369 = vrcp.f32 %v1181_v16  ;;  %v1184_v18 = vadd.f32 1.0, %v3358_v1 }
 0x96e   :  { %v3362_v35 = vpop.eup %3361  ;;  %3371 = vrcp.f32 %v1183_v2  ;;  %v1180_v3 = vadd.f32 1.0, %v3360_v44  ;;  %v1221_v2 = vrot.slane %v4160_v22, 7  ;;  %v1223_v44 = vrot.slane %v4152_v9, 7 }
 0x96f   :  { %1266 = vrot.lane.b32.xlu0 %v3350_v57, %s3676_s14  ;;  %v3364_v6 = vpop.eup %3363  ;;  %3373 = vrcp.f32 %v1184_v18  ;;  %v1185_v42 = vadd.f32 1.0, %v3362_v35  ;;  %v1225_v9 = vrot.slane %v4170_v63, 7 }
 0x970   :  { %1264 = vrot.lane.b32.xlu1 %v3352_v21, %s3676_s14  ;;  %v3366_v29 = vpop.eup %3365  ;;  %3375 = vrcp.f32 %v1180_v3  ;;  %v1182_v36 = vadd.f32 1.0, %v3364_v6  ;;  %v1224_v3 = vrot.slane %v4163_v41, 7 }
 0x971   :  { %v3368_v60 = vpop.eup %3367  ;;  %3377 = vrcp.f32 %v1185_v42  ;;  %v1187_v27 = vadd.f32 1.0, %v3366_v29 }
 0x972   :  { %3379 = vrcp.f32 %v1182_v36  ;;  %v1186_v37 = vadd.f32 1.0, %v3368_v60  ;;  %v1220_v36 = vrot.slane %v4141_v20, 7 }
 0x973   :  { %3381 = vrcp.f32 %v1187_v27 }
 0x974   :  { %3383 = vrcp.f32 %v1186_v37 }
 0x977   :  { %v4314_v46 = vpop.eup %3369 }
 0x978   :  { %v4317_v56 = vpop.eup %3371  ;;  %v1237_v18 = vmul.f32 %v4314_v46, %v1221_v2 }
 0x979   :  { %v4321_v40 = vpop.eup %3373  ;;  %v1239_v6 = vmul.f32 %v4317_v56, %v1223_v44 }
 0x97a   :  { %v4325_v19 = vpop.eup %3375  ;;  %v1240_v22 = vmul.f32 %v4321_v40, %v1224_v3 }
 0x97b   :  { %v4329_v8 = vpop.eup %3377  ;;  %v1236_v41 = vmul.f32 %v4325_v19, %v1220_v36 }
 0x97c   :  { %v4333_v30 = vpop.eup %3379  ;;  %v1241_v20 = vmul.f32 %v4329_v8, %v1225_v9 }
 0x97d   :  { %v4337_v33 = vpop.eup %3381 }
 0x97e   :  { %v4341_v39 = vpop.eup %3383 }
 0x9d5   :  { %v1255_v32 = vpop.permute.xlu0 %1254 }
 0x9d6   :  { %v1277_v31 = vmul.f32 %v4314_v46, %v1255_v32  ;;  %v1259_v13 = vpop.permute.xlu1 %1258 }
 0x9d7   :  { %v1279_v43 = vmul.f32 %v4317_v56, %v1259_v13 }
 0x9d8   :  { %1294 = vrot.lane.b32.xlu0 %v1277_v31, %s3677_s21  ;;  %v1222_v31 = vrot.slane %v4149_v49, 7 }
 0x9d9   :  { %v1261_v24 = vpop.permute.xlu0 %1260  ;;  %1298 = vrot.lane.b32.xlu1 %v1279_v43, %s3677_s21 }
 0x9da   :  { %v1280_v50 = vmul.f32 %v4321_v40, %v1261_v24  ;;  %v1253_v57 = vpop.permute.xlu1 %1252  ;;  %v1227_v24 = vrot.slane %v4177_v15, 7  ;;  %v1238_v63 = vmul.f32 %v4333_v30, %v1222_v31 }
 0x9db   :  { %v1276_v21 = vmul.f32 %v4325_v19, %v1253_v57 }
 0x9dc   :  { %1300 = vrot.lane.b32.xlu0 %v1280_v50, %s3677_s21  ;;  %v1243_v49 = vmul.f32 %v4337_v33, %v1227_v24 }
 0x9dd   :  { %v1263_v61 = vpop.permute.xlu0 %1262  ;;  %1292 = vrot.lane.b32.xlu1 %v1276_v21, %s3677_s21  ;;  %v1226_v21 = vrot.slane %v4172_v59, 7 }
 0x9de   :  { %v1281_v12 = vmul.f32 %v4329_v8, %v1263_v61  ;;  %v1257_v55 = vpop.permute.xlu1 %1256 }
 0x9df   :  { %v1278_v23 = vmul.f32 %v4333_v30, %v1257_v55  ;;  %v1242_v15 = vmul.f32 %v4341_v39, %v1226_v21 }
 0x9e0   :  { %1302 = vrot.lane.b32.xlu0 %v1281_v12, %s3677_s21 }
 0x9e1   :  { %v1267_v62 = vpop.permute.xlu0 %1266  ;;  %1296 = vrot.lane.b32.xlu1 %v1278_v23, %s3677_s21 }
 0x9e2   :  { %v1283_v38 = vmul.f32 %v4337_v33, %v1267_v62  ;;  %v1265_v16 = vpop.permute.xlu1 %1264 }
 0x9e3   :  { %v1282_v1 = vmul.f32 %v4341_v39, %v1265_v16 }
 0x9e4   :  { %1306 = vrot.lane.b32.xlu0 %v1283_v38, %s3677_s21 }
 0x9e5   :  { %1304 = vrot.lane.b32.xlu1 %v1282_v1, %s3677_s21 }
 0xa4a   :  { %v1295_v35 = vpop.permute.xlu0 %1294 }
 0xa4b   :  { %v4351_v42 = vadd.f32 %v1295_v35, %v1237_v18  ;;  %v1299_v29 = vpop.permute.xlu1 %1298 }
 0xa4c   :  { %v4354_v60 = vadd.f32 %v1299_v29, %v1239_v6 }
 0xa4d   :  { %3385 = vtanh.f32 %v4351_v42 }
 0xa4e   :  { %v1301_v27 = vpop.permute.xlu0 %1300  ;;  %3387 = vtanh.f32 %v4354_v60 }
 0xa4f   :  { %v4361_v32 = vadd.f32 %v1301_v27, %v1240_v22  ;;  %v1293_v37 = vpop.permute.xlu1 %1292 }
 0xa50   :  { %v4364_v13 = vadd.f32 %v1293_v37, %v1236_v41 }
 0xa51   :  { %3389 = vtanh.f32 %v4361_v32 }
 0xa52   :  { %v1303_v43 = vpop.permute.xlu0 %1302  ;;  %3391 = vtanh.f32 %v4364_v13 }
 0xa53   :  { %v4371_v50 = vadd.f32 %v1303_v43, %v1241_v20  ;;  %v1297_v57 = vpop.permute.xlu1 %1296 }
 0xa54   :  { %v4374_v61 = vadd.f32 %v1297_v57, %v1238_v63 }
 0xa55   :  { %3393 = vtanh.f32 %v4371_v50 }
 0xa56   :  { %v1307_v12 = vpop.permute.xlu0 %1306  ;;  %3395 = vtanh.f32 %v4374_v61 }
 0xa57   :  { %v3386_v55 = vpop.eup %3385  ;;  %v4380_v23 = vadd.f32 %v1307_v12, %v1243_v49  ;;  %v1305_v62 = vpop.permute.xlu1 %1304 }
 0xa58   :  { %1342 = vrot.lane.b32.xlu0 %v3386_v55, %s3676_s14  ;;  %v3388_v38 = vpop.eup %3387  ;;  %v4383_v16 = vadd.f32 %v1305_v62, %v1242_v15 }
 0xa59   :  { %3397 = vtanh.f32 %v4380_v23  ;;  %1346 = vrot.lane.b32.xlu1 %v3388_v38, %s3676_s14 }
 0xa5a   :  { %3399 = vtanh.f32 %v4383_v16 }
 0xa5b   :  { %v3390_v59 = vpop.eup %3389 }
 0xa5c   :  { %1348 = vrot.lane.b32.xlu0 %v3390_v59, %s3676_s14  ;;  %v3392_v1 = vpop.eup %3391 }
 0xa5d   :  { %1340 = vrot.lane.b32.xlu1 %v3392_v1, %s3676_s14 }
 0xa5f   :  { %v3394_v2 = vpop.eup %3393 }
 0xa60   :  { %1350 = vrot.lane.b32.xlu0 %v3394_v2, %s3676_s14  ;;  %v3396_v44 = vpop.eup %3395 }
 0xa61   :  { %1344 = vrot.lane.b32.xlu1 %v3396_v44, %s3676_s14 }
 0xa63   :  { %v3398_v18 = vpop.eup %3397 }
 0xa64   :  { %1354 = vrot.lane.b32.xlu0 %v3398_v18, %s3676_s14  ;;  %v3400_v35 = vpop.eup %3399 }
 0xa65   :  { %1352 = vrot.lane.b32.xlu1 %v3400_v35, %s3676_s14 }
 0xaca   :  { %v1343_v3 = vpop.permute.xlu0 %1342 }
 0xacb   :  { %v1365_v6 = vmul.f32 %v4314_v46, %v1343_v3  ;;  %v1347_v29 = vpop.permute.xlu1 %1346 }
 0xacc   :  { %v1367_v36 = vmul.f32 %v4317_v56, %v1347_v29 }
 0xacd   :  { %v4398_v22 = vsel %vm2734_vm11, %v4217_v28, %v1365_v6 }
 0xace   :  { %v1349_v27 = vpop.permute.xlu0 %1348  ;;  %v4402_v9 = vsel %vm2734_vm11, %v4206_v48, %v1367_v36 }
 0xacf   :  { %v1368_v41 = vmul.f32 %v4321_v40, %v1349_v27  ;;  %v1341_v37 = vpop.permute.xlu1 %1340 }
 0xad0   :  { %v1364_v31 = vmul.f32 %v4325_v19, %v1341_v37  ;;  %v1381_v19 = vrot.slane %v1365_v6, 2 }
 0xad1   :  { %v4408_v46 = vsel %vm2734_vm11, %v4220_v17, %v1368_v41  ;;  %v1386_v12 = vrot.slane %v1368_v41, 7 }
 0xad2   :  { %v1351_v20 = vpop.permute.xlu0 %1350  ;;  %v4412_v56 = vsel %vm2734_vm11, %v4192_v47, %v1364_v31  ;;  %v1380_v43 = vrot.slane %v1364_v31, 3 }
 0xad3   :  { %v1369_v28 = vmul.f32 %v4329_v8, %v1351_v20  ;;  %v1345_v24 = vpop.permute.xlu1 %1344 }
 0xad4   :  { %v1366_v48 = vmul.f32 %v4333_v30, %v1345_v24  ;;  %v1382_v21 = vsel %vm366_vm2, %v1381_v19, %v1380_v43 }
 0xad5   :  { %v4418_v40 = vsel %vm2734_vm11, %v4234_v10, %v1369_v28  ;;  %v1388_v8 = vrot.slane %v1369_v28, 6 }
 0xad6   :  { %v1355_v63 = vpop.permute.xlu0 %1354  ;;  %v1383_v57 = vrot.slane %v1366_v48, 1  ;;  %v4422_v17 = vsel %vm2734_vm11, %v4203_v51, %v1366_v48 }
 0xad7   :  { %v1371_v47 = vmul.f32 %v4337_v33, %v1355_v63  ;;  %v1353_v49 = vpop.permute.xlu1 %1352 }
 0xad8   :  { %v1384_v30 = vsel %vm369_vm3, %v1383_v57, %v1382_v21  ;;  %v1370_v55 = vmul.f32 %v4341_v39, %v1353_v49 }
 0xad9   :  { %v4430_v10 = vsel %vm2734_vm11, %v4247_v14, %v1371_v47  ;;  %v1385_v15 = vsel %vm372_vm4, %v1367_v36, %v1384_v30  ;;  %v1392_v62 = vrot.slane %v1371_v47, 4 }
 0xada   :  { %v1390_v51 = vrot.slane %v1370_v55, 5  ;;  %v4435_v33 = vsel %vm2734_vm11, %v4238_v58, %v1370_v55  ;;  %v1387_v38 = vsel %vm375_vm5, %v1386_v12, %v1385_v15 }
 0xadb   :  { %v1389_v59 = vsel %vm378_vm6, %v1388_v8, %v1387_v38 }
 0xadc   :  { %v1391_v1 = vsel %vm381_vm7, %v1390_v51, %v1389_v59 }
 0xadd   :  { %v1393_v39 = vsel %vm384_vm8, %v1392_v62, %v1391_v1 }
 0xade   :  { %1394 = vrot.lane.b32.xlu1 %v1393_v39, %s3677_s21 }
 0xb50   :  { %v1395_v14 = vpop.permute.xlu1 %1394 }
 0xb51   :  { %3056 = vmatmul.mubr.msk.f32.vlgmr.msra.gmra.mrb[4].mxu0 %vm18_vm0, %v1395_v14 }
 0xb52   :  { %3129 = vmatpush3.bf16.msra.mxu0 %v3721_v5  ;;  %3077 = vmatprep.mubr.msk.f32.mxu0 %vm3674_vm1, %v3675_v4 }
 0xb53   :  { %3130 = vmatprep.subr.bf16.mxu0 %v3673_v0 }
 0xb56   :  { %3132 = vmatpush3.bf16.msra.mxu0 %v3730_v7 }
 0xc24   :  { %v1464_v58 = vpop.f32.mrb[4].mxu0 }
 0xc25   :  { %v1469_v2 = vrot.slane %v1464_v58, 4  ;;  %v3057_v44 = vpop.f32.mrb[5].mxu0  ;;  %v1471_v35 = vrot.slane %v1464_v58, 6  ;;  %v1473_v3 = vrot.slane %v1464_v58, 1  ;;  %v1470_v29 = vrot.slane %v1464_v58, 5 }
 0xc26   :  { %v1488_v36 = vadd.f32 %v4273_v45, %v1464_v58  ;;  %v1474_v41 = vrot.slane %v1464_v58, 2  ;;  %v1472_v31 = vrot.slane %v1464_v58, 7  ;;  %v1475_v43 = vrot.slane %v1464_v58, 3 }
 0xc27   :  { %v1484_v18 = vadd.f32 %v4279_v25, %v1469_v2  ;;  %v1486_v6 = vadd.f32 %v4291_v52, %v1471_v35  ;;  %v1489_v37 = vadd.f32 %v4285_v11, %v1473_v3  ;;  %v1485_v20 = vadd.f32 %v4261_v26, %v1470_v29 }
 0xc28   :  { %v1490_v28 = vadd.f32 %v4303_v34, %v1474_v41  ;;  %v1487_v24 = vadd.f32 %v4267_v54, %v1472_v31  ;;  %v1491_v19 = vadd.f32 %v4297_v53, %v1475_v43  ;;  %v2932_v55 = vmul.f32 -1.442695, %v1488_v36 }
 0xc29   :  { %3401 = vtanh.f32 %v1484_v18  ;;  %v2928_v12 = vmul.f32 -1.442695, %v1484_v18  ;;  %v2930_v30 = vmul.f32 -1.442695, %v1486_v6  ;;  %v2933_v62 = vmul.f32 -1.442695, %v1489_v37 }
 0xc2a   :  { %3403 = vtanh.f32 %v1486_v6  ;;  %v2929_v51 = vmul.f32 -1.442695, %v1485_v20  ;;  %v2934_v59 = vmul.f32 -1.442695, %v1490_v28  ;;  %v2931_v1 = vmul.f32 -1.442695, %v1487_v24 }
 0xc2b   :  { %3405 = vtanh.f32 %v1488_v36  ;;  %v2935_v14 = vmul.f32 -1.442695, %v1491_v19 }
 0xc2c   :  { %3407 = vtanh.f32 %v1489_v37 }
 0xc2d   :  { %3409 = vtanh.f32 %v1485_v20 }
 0xc2e   :  { %3411 = vtanh.f32 %v1490_v28 }
 0xc2f   :  { %3413 = vtanh.f32 %v1487_v24 }
 0xc30   :  { %3415 = vtanh.f32 %v1491_v19 }
 0xc31   :  { %3417 = vpow2.f32 %v2928_v12 }
 0xc32   :  { %3419 = vpow2.f32 %v2930_v30 }
 0xc33   :  { %v3402_v27 = vpop.eup %3401  ;;  %3421 = vpow2.f32 %v2932_v55 }
 0xc34   :  { %1588 = vrot.lane.b32.xlu0 %v3402_v27, %s3676_s14  ;;  %v3404_v48 = vpop.eup %3403  ;;  %3423 = vpow2.f32 %v2933_v62 }
 0xc35   :  { %v3406_v63 = vpop.eup %3405  ;;  %3425 = vpow2.f32 %v2929_v51 }
 0xc36   :  { %1596 = vrot.lane.b32.xlu1 %v3406_v63, %s3676_s14  ;;  %v3408_v57 = vpop.eup %3407 }
 0xc37   :  { %v3410_v47 = vpop.eup %3409 }
 0xc38   :  { %1592 = vrot.lane.b32.xlu0 %v3404_v48, %s3676_s14  ;;  %v3412_v21 = vpop.eup %3411 }
 0xc39   :  { %v3414_v8 = vpop.eup %3413 }
 0xc3a   :  { %1590 = vrot.lane.b32.xlu1 %v3410_v47, %s3676_s14  ;;  %v3416_v49 = vpop.eup %3415 }
 0xc3b   :  { %v3418_v15 = vpop.eup %3417 }
 0xc3c   :  { %1598 = vrot.lane.b32.xlu0 %v3408_v57, %s3676_s14  ;;  %v1516_v38 = vadd.f32 1.0, %v3418_v15  ;;  %v3420_v39 = vpop.eup %3419 }
 0xc3d   :  { %v3422_v58 = vpop.eup %3421  ;;  %v1518_v2 = vadd.f32 1.0, %v3420_v39 }
 0xc3e   :  { %1594 = vrot.lane.b32.xlu1 %v3414_v8, %s3676_s14  ;;  %3427 = vrcp.f32 %v1516_v38  ;;  %v3424_v44 = vpop.eup %3423  ;;  %v1520_v18 = vadd.f32 1.0, %v3422_v58 }
 0xc3f   :  { %3429 = vpow2.f32 %v2934_v59  ;;  %v3426_v35 = vpop.eup %3425  ;;  %v1521_v29 = vadd.f32 1.0, %v3424_v44 }
 0xc40   :  { %1600 = vrot.lane.b32.xlu0 %v3412_v21, %s3676_s14  ;;  %3431 = vpow2.f32 %v2931_v1  ;;  %v1517_v41 = vadd.f32 1.0, %v3426_v35 }
 0xc41   :  { %3433 = vpow2.f32 %v2935_v14 }
 0xc42   :  { %1602 = vrot.lane.b32.xlu1 %v3416_v49, %s3676_s14  ;;  %3435 = vrcp.f32 %v1518_v2  ;;  %v1556_v2 = vrot.slane %v4364_v13, 7 }
 0xc43   :  { %3437 = vrcp.f32 %v1520_v18 }
 0xc44   :  { %3439 = vrcp.f32 %v1521_v29  ;;  %v1560_v29 = vrot.slane %v4361_v32, 7 }
 0xc45   :  { %3441 = vrcp.f32 %v1517_v41  ;;  %v1561_v41 = vrot.slane %v4371_v50, 7 }
 0xc48   :  { %v4464_v3 = vpop.eup %3427 }
 0xc49   :  { %v3430_v36 = vpop.eup %3429  ;;  %v1572_v44 = vmul.f32 %v4464_v3, %v1556_v2 }
 0xc4a   :  { %v3432_v37 = vpop.eup %3431  ;;  %v1522_v31 = vadd.f32 1.0, %v3430_v36 }
 0xc4b   :  { %v1519_v20 = vadd.f32 1.0, %v3432_v37  ;;  %v3434_v28 = vpop.eup %3433 }
 0xc4c   :  { %3443 = vrcp.f32 %v1522_v31  ;;  %v4468_v43 = vpop.eup %3435  ;;  %v1523_v48 = vadd.f32 1.0, %v3434_v28  ;;  %v1557_v28 = vrot.slane %v4351_v42, 7  ;;  %v1559_v42 = vrot.slane %v4354_v60, 7 }
 0xc4d   :  { %3445 = vrcp.f32 %v1519_v20  ;;  %v4471_v63 = vpop.eup %3437 }
 0xc4e   :  { %v4475_v21 = vpop.eup %3439  ;;  %3447 = vrcp.f32 %v1523_v48  ;;  %v1576_v37 = vmul.f32 %v4471_v63, %v1560_v29  ;;  %v1562_v48 = vrot.slane %v4383_v16, 7 }
 0xc4f   :  { %v4479_v12 = vpop.eup %3441 }
 0xc50   :  { %v1573_v50 = vmul.f32 %v4479_v12, %v1557_v28 }
 0xc56   :  { %v4483_v15 = vpop.eup %3443 }
 0xc57   :  { %v4487_v38 = vpop.eup %3445 }
 0xc58   :  { %v4492_v39 = vpop.eup %3447  ;;  %v1575_v16 = vmul.f32 %v4487_v38, %v1559_v42 }
 0xca6   :  { %v1589_v6 = vpop.permute.xlu0 %1588 }
 0xca7   :  { %v1612_v27 = vmul.f32 %v4464_v3, %v1589_v6  ;;  %v1558_v6 = vrot.slane %v4374_v61, 7  ;;  %v1577_v61 = vmul.f32 %v4475_v21, %v1561_v41 }
 0xca8   :  { %v1597_v57 = vpop.permute.xlu1 %1596 }
 0xca9   :  { %1628 = vrot.lane.b32.xlu0 %v1612_v27, %s3677_s21  ;;  %v1616_v47 = vmul.f32 %v4471_v63, %v1597_v57  ;;  %v1574_v36 = vmul.f32 %v4468_v43, %v1558_v6 }
 0xcaa   :  { %v1593_v24 = vpop.permute.xlu0 %1592 }
 0xcab   :  { %v1614_v19 = vmul.f32 %v4468_v43, %v1593_v24  ;;  %1636 = vrot.lane.b32.xlu1 %v1616_v47, %s3677_s21 }
 0xcac   :  { %v1591_v30 = vpop.permute.xlu1 %1590 }
 0xcad   :  { %1632 = vrot.lane.b32.xlu0 %v1614_v19, %s3677_s21  ;;  %v1613_v55 = vmul.f32 %v4479_v12, %v1591_v30 }
 0xcae   :  { %v1599_v8 = vpop.permute.xlu0 %1598 }
 0xcaf   :  { %v1617_v49 = vmul.f32 %v4475_v21, %v1599_v8  ;;  %1630 = vrot.lane.b32.xlu1 %v1613_v55, %s3677_s21  ;;  %v1578_v8 = vmul.f32 %v4483_v15, %v1562_v48 }
 0xcb0   :  { %v1595_v59 = vpop.permute.xlu1 %1594 }
 0xcb1   :  { %1638 = vrot.lane.b32.xlu0 %v1617_v49, %s3677_s21  ;;  %v1615_v1 = vmul.f32 %v4487_v38, %v1595_v59 }
 0xcb2   :  { %v1601_v62 = vpop.permute.xlu0 %1600 }
 0xcb3   :  { %v1618_v51 = vmul.f32 %v4483_v15, %v1601_v62  ;;  %1634 = vrot.lane.b32.xlu1 %v1615_v1, %s3677_s21  ;;  %v1563_v62 = vrot.slane %v4380_v23, 7 }
 0xcb4   :  { %v1603_v14 = vpop.permute.xlu1 %1602 }
 0xcb5   :  { %1640 = vrot.lane.b32.xlu0 %v1618_v51, %s3677_s21  ;;  %v1619_v58 = vmul.f32 %v4492_v39, %v1603_v14  ;;  %v1579_v59 = vmul.f32 %v4492_v39, %v1563_v62 }
 0xcb7   :  { %1642 = vrot.lane.b32.xlu1 %v1619_v58, %s3677_s21 }
 0xd1b   :  { %v1629_v18 = vpop.permute.xlu0 %1628 }
 0xd1c   :  { %v4498_v35 = vadd.f32 %v1629_v18, %v1572_v44 }
 0xd1d   :  { %v1637_v13 = vpop.permute.xlu1 %1636 }
 0xd1e   :  { %3449 = vtanh.f32 %v4498_v35  ;;  %v4509_v24 = vadd.f32 %v1637_v13, %v1576_v37 }
 0xd1f   :  { %v1633_v27 = vpop.permute.xlu0 %1632 }
 0xd20   :  { %v4506_v31 = vadd.f32 %v1633_v27, %v1574_v36 }
 0xd21   :  { %v1631_v57 = vpop.permute.xlu1 %1630 }
 0xd22   :  { %3451 = vtanh.f32 %v4506_v31  ;;  %v4520_v47 = vadd.f32 %v1631_v57, %v1573_v50 }
 0xd23   :  { %v1639_v32 = vpop.permute.xlu0 %1638  ;;  %3453 = vtanh.f32 %v4509_v24 }
 0xd24   :  { %v4517_v19 = vadd.f32 %v1639_v32, %v1577_v61 }
 0xd25   :  { %v1635_v55 = vpop.permute.xlu1 %1634 }
 0xd26   :  { %3455 = vtanh.f32 %v4517_v19  ;;  %v4529_v51 = vadd.f32 %v1635_v55, %v1575_v16 }
 0xd27   :  { %v1641_v49 = vpop.permute.xlu0 %1640  ;;  %3457 = vtanh.f32 %v4520_v47 }
 0xd28   :  { %v3450_v20 = vpop.eup %3449  ;;  %v4526_v30 = vadd.f32 %v1641_v49, %v1578_v8 }
 0xd29   :  { %1676 = vrot.lane.b32.xlu0 %v3450_v20, %s3676_s14  ;;  %v1643_v1 = vpop.permute.xlu1 %1642 }
 0xd2a   :  { %3459 = vtanh.f32 %v4526_v30  ;;  %v4535_v58 = vadd.f32 %v1643_v1, %v1579_v59 }
 0xd2b   :  { %3461 = vtanh.f32 %v4529_v51 }
 0xd2c   :  { %v3452_v60 = vpop.eup %3451  ;;  %3463 = vtanh.f32 %v4535_v58 }
 0xd2d   :  { %1680 = vrot.lane.b32.xlu0 %v3452_v60, %s3676_s14  ;;  %v3454_v14 = vpop.eup %3453 }
 0xd2e   :  { %1684 = vrot.lane.b32.xlu1 %v3454_v14, %s3676_s14 }
 0xd30   :  { %v3456_v2 = vpop.eup %3455 }
 0xd31   :  { %1686 = vrot.lane.b32.xlu0 %v3456_v2, %s3676_s14  ;;  %v3458_v23 = vpop.eup %3457 }
 0xd32   :  { %1678 = vrot.lane.b32.xlu1 %v3458_v23, %s3676_s14 }
 0xd34   :  { %v3460_v44 = vpop.eup %3459 }
 0xd35   :  { %1688 = vrot.lane.b32.xlu0 %v3460_v44, %s3676_s14  ;;  %v3462_v18 = vpop.eup %3461 }
 0xd36   :  { %1682 = vrot.lane.b32.xlu1 %v3462_v18, %s3676_s14  ;;  %v3464_v6 = vpop.eup %3463 }
 0xd3a   :  { %1690 = vrot.lane.b32.xlu1 %v3464_v6, %s3676_s14 }
 0xd9b   :  { %v1677_v29 = vpop.permute.xlu0 %1676 }
 0xd9c   :  { %v1700_v36 = vmul.f32 %v4464_v3, %v1677_v29 }
 0xd9e   :  { %v4547_v27 = vsel %vm2743_vm12, %v4412_v56, %v1700_v36  ;;  %v1716_v57 = vrot.slane %v1700_v36, 4 }
 0xd9f   :  { %v1681_v41 = vpop.permute.xlu0 %1680 }
 0xda0   :  { %v1702_v37 = vmul.f32 %v4468_v43, %v1681_v41  ;;  %v1685_v13 = vpop.permute.xlu1 %1684 }
 0xda1   :  { %v1704_v20 = vmul.f32 %v4471_v63, %v1685_v13 }
 0xda2   :  { %v4553_v28 = vsel %vm2743_vm12, %v4422_v17, %v1702_v37  ;;  %v1719_v50 = vrot.slane %v1702_v37, 2 }
 0xda3   :  { %v1687_v61 = vpop.permute.xlu0 %1686  ;;  %v4557_v32 = vsel %vm2743_vm12, %v4408_v46, %v1704_v20 }
 0xda4   :  { %v1705_v3 = vmul.f32 %v4475_v21, %v1687_v61  ;;  %v1679_v48 = vpop.permute.xlu1 %1678 }
 0xda5   :  { %v1701_v56 = vmul.f32 %v4479_v12, %v1679_v48 }
 0xda6   :  { %v4563_v43 = vsel %vm2743_vm12, %v4418_v40, %v1705_v3 }
 0xda7   :  { %v1689_v63 = vpop.permute.xlu0 %1688  ;;  %v1717_v42 = vrot.slane %v1701_v56, 3  ;;  %v4567_v17 = vsel %vm2743_vm12, %v4398_v22, %v1701_v56  ;;  %v1724_v22 = vrot.slane %v1705_v3, 7 }
 0xda8   :  { %v1706_v46 = vmul.f32 %v4483_v15, %v1689_v63  ;;  %v1683_v8 = vpop.permute.xlu1 %1682 }
 0xda9   :  { %v1718_v21 = vsel %vm366_vm2, %v1717_v42, %v1716_v57  ;;  %v1703_v49 = vmul.f32 %v4487_v38, %v1683_v8 }
 0xdaa   :  { %v4574_v12 = vsel %vm2743_vm12, %v4435_v33, %v1706_v46  ;;  %v1720_v40 = vsel %vm369_vm3, %v1719_v50, %v1718_v21  ;;  %v1726_v60 = vrot.slane %v1706_v46, 6 }
 0xdab   :  { %v1721_v16 = vrot.slane %v1703_v49, 1  ;;  %v4579_v55 = vsel %vm2743_vm12, %v4402_v9, %v1703_v49 }
 0xdac   :  { %v1691_v62 = vpop.permute.xlu1 %1690 }
 0xdad   :  { %v1722_v15 = vsel %vm372_vm4, %v1721_v16, %v1720_v40  ;;  %v1707_v59 = vmul.f32 %v4492_v39, %v1691_v62 }
 0xdae   :  { %v1723_v38 = vsel %vm375_vm5, %v1704_v20, %v1722_v15 }
 0xdaf   :  { %v1725_v1 = vsel %vm378_vm6, %v1724_v22, %v1723_v38  ;;  %v1728_v33 = vrot.slane %v1707_v59, 5  ;;  %v4587_v14 = vsel %vm2743_vm12, %v4430_v10, %v1707_v59 }
 0xdb0   :  { %v1727_v2 = vsel %vm381_vm7, %v1726_v60, %v1725_v1 }
 0xdb1   :  { %v1729_v9 = vsel %vm384_vm8, %v1728_v33, %v1727_v2 }
 0xdb2   :  { %1730 = vrot.lane.b32.xlu0 %v1729_v9, %s3677_s21 }
 0xe24   :  { %v1731_v23 = vpop.permute.xlu0 %1730 }
 0xe25   :  { %3067 = vmatmul.mubr.msk.f32.vlgmr.msra.gmra.mrb[4].mxu1 %vm18_vm0, %v1731_v23 }
 0xe26   :  { %3135 = vmatpush3.bf16.msra.mxu1 %v3721_v5  ;;  %3088 = vmatprep.mubr.msk.f32.mxu1 %vm3674_vm1, %v3675_v4  ;;  %vm2846_vm1 = vcmask 261127  }
 0xe27   :  { %3136 = vmatprep.subr.bf16.mxu1 %v3673_v0 }
 0xe2a   :  { %3138 = vmatpush3.bf16.msra.mxu1 %v3730_v7 }
 0xef8   :  { %v1800_v10 = vpop.f32.mrb[4].mxu1 }
 0xef9   :  { %v1805_v39 = vrot.slane %v1800_v10, 3  ;;  %v3068_v44 = vpop.f32.mrb[5].mxu1  ;;  %v1806_v6 = vrot.slane %v1800_v10, 4  ;;  %v1807_v29 = vrot.slane %v1800_v10, 5  ;;  %v1808_v36 = vrot.slane %v1800_v10, 6 }
 0xefa   :  { %v1809_v37 = vrot.slane %v1800_v10, 7  ;;  %v1810_v13 = vrot.slane %v1800_v10, 1  ;;  %v1825_v61 = vadd.f32 %v4285_v11, %v1800_v10 }
 0xefb   :  { %v1820_v18 = vadd.f32 %v4279_v25, %v1805_v39  ;;  %v1821_v41 = vadd.f32 %v4261_v26, %v1806_v6  ;;  %v1822_v5 = vadd.f32 %v4291_v52, %v1807_v29  ;;  %v1823_v4 = vadd.f32 %v4267_v54, %v1808_v36 }
 0xefc   :  { %v1824_v7 = vadd.f32 %v4273_v45, %v1809_v37  ;;  %v1811_v25 = vrot.slane %v1800_v10, 2  ;;  %v1826_v20 = vadd.f32 %v4303_v34, %v1810_v13  ;;  %v2942_v21 = vmul.f32 -1.442695, %v1825_v61 }
 0xefd   :  { %3465 = vtanh.f32 %v1820_v18  ;;  %v2937_v48 = vmul.f32 -1.442695, %v1820_v18  ;;  %v2938_v56 = vmul.f32 -1.442695, %v1821_v41  ;;  %v2939_v50 = vmul.f32 -1.442695, %v1822_v5 }
 0xefe   :  { %3467 = vtanh.f32 %v1821_v41  ;;  %v1827_v26 = vadd.f32 %v4297_v53, %v1811_v25  ;;  %v2940_v63 = vmul.f32 -1.442695, %v1823_v4  ;;  %v2941_v42 = vmul.f32 -1.442695, %v1824_v7 }
 0xeff   :  { %3469 = vtanh.f32 %v1822_v5  ;;  %v2943_v46 = vmul.f32 -1.442695, %v1826_v20 }
 0xf00   :  { %3471 = vtanh.f32 %v1823_v4  ;;  %v2944_v49 = vmul.f32 -1.442695, %v1827_v26 }
 0xf01   :  { %3473 = vtanh.f32 %v1824_v7 }
 0xf02   :  { %3475 = vtanh.f32 %v1826_v20 }
 0xf03   :  { %3477 = vtanh.f32 %v1825_v61 }
 0xf04   :  { %3479 = vtanh.f32 %v1827_v26 }
 0xf05   :  { %3481 = vpow2.f32 %v2937_v48  ;;  %v1892_v48 = vrot.slane %v4498_v35, 7 }
 0xf06   :  { %3483 = vpow2.f32 %v2938_v56 }
 0xf07   :  { %v3466_v0 = vpop.eup %3465  ;;  %3485 = vpow2.f32 %v2939_v50 }
 0xf08   :  { %1924 = vrot.lane.b32.xlu1 %v3466_v0, %s3676_s14  ;;  %v3468_v52 = vpop.eup %3467  ;;  %3487 = vpow2.f32 %v2940_v63 }
 0xf09   :  { %v3470_v54 = vpop.eup %3469  ;;  %1926 = vrot.lane.b32.xlu0 %v3468_v52, %s3676_s14  ;;  %3489 = vpow2.f32 %v2941_v42  ;;  %v1894_v42 = vrot.slane %v4506_v31, 7 }
 0xf0a   :  { %v3472_v45 = vpop.eup %3471  ;;  %3491 = vpow2.f32 %v2943_v46 }
 0xf0b   :  { %v3474_v3 = vpop.eup %3473 }
 0xf0c   :  { %1928 = vrot.lane.b32.xlu1 %v3470_v54, %s3676_s14  ;;  %v3476_v34 = vpop.eup %3475 }
 0xf0d   :  { %1930 = vrot.lane.b32.xlu0 %v3472_v45, %s3676_s14  ;;  %v3478_v11 = vpop.eup %3477 }
 0xf0e   :  { %v3480_v53 = vpop.eup %3479 }
 0xf0f   :  { %v3482_v57 = vpop.eup %3481 }
 0xf10   :  { %1932 = vrot.lane.b32.xlu1 %v3474_v3, %s3676_s14  ;;  %v1852_v8 = vadd.f32 1.0, %v3482_v57  ;;  %v3484_v40 = vpop.eup %3483  ;;  %v1893_v57 = vrot.slane %v4520_v47, 7 }
 0xf11   :  { %1936 = vrot.lane.b32.xlu0 %v3476_v34, %s3676_s14  ;;  %v3486_v16 = vpop.eup %3485  ;;  %v1853_v22 = vadd.f32 1.0, %v3484_v40 }
 0xf12   :  { %3493 = vrcp.f32 %v1852_v8  ;;  %v3488_v62 = vpop.eup %3487  ;;  %v1854_v60 = vadd.f32 1.0, %v3486_v16  ;;  %v1896_v16 = vrot.slane %v4509_v24, 7  ;;  %v1897_v24 = vrot.slane %v4517_v19, 7 }
 0xf13   :  { %3495 = vpow2.f32 %v2942_v21  ;;  %v3490_v15 = vpop.eup %3489  ;;  %v1855_v38 = vadd.f32 1.0, %v3488_v62 }
 0xf14   :  { %1934 = vrot.lane.b32.xlu1 %v3478_v11, %s3676_s14  ;;  %3497 = vpow2.f32 %v2944_v49  ;;  %v3492_v59 = vpop.eup %3491  ;;  %v1856_v2 = vadd.f32 1.0, %v3490_v15  ;;  %v1895_v49 = vrot.slane %v4529_v51, 7  ;;  %v1898_v15 = vrot.slane %v4526_v30, 7 }
 0xf15   :  { %1938 = vrot.lane.b32.xlu0 %v3480_v53, %s3676_s14  ;;  %3499 = vrcp.f32 %v1853_v22  ;;  %v1858_v10 = vadd.f32 1.0, %v3492_v59  ;;  %v1899_v30 = vrot.slane %v4535_v58, 7 }
 0xf16   :  { %3501 = vrcp.f32 %v1854_v60 }
 0xf17   :  { %3503 = vrcp.f32 %v1855_v38 }
 0xf18   :  { %3505 = vrcp.f32 %v1856_v2 }
 0xf19   :  { %3507 = vrcp.f32 %v1858_v10 }
 0xf1c   :  { %v4614_v1 = vpop.eup %3493 }
 0xf1d   :  { %v3496_v9 = vpop.eup %3495  ;;  %v1908_v56 = vmul.f32 %v4614_v1, %v1892_v48 }
 0xf1e   :  { %v3498_v39 = vpop.eup %3497  ;;  %v1857_v44 = vadd.f32 1.0, %v3496_v9 }
 0xf1f   :  { %v1859_v18 = vadd.f32 1.0, %v3498_v39  ;;  %v4618_v6 = vpop.eup %3499 }
 0xf20   :  { %3509 = vrcp.f32 %v1857_v44  ;;  %v4620_v36 = vpop.eup %3501  ;;  %v1909_v46 = vmul.f32 %v4618_v6, %v1893_v57 }
 0xf21   :  { %3511 = vrcp.f32 %v1859_v18  ;;  %v4625_v13 = vpop.eup %3503  ;;  %v1910_v21 = vmul.f32 %v4620_v36, %v1894_v42 }
 0xf22   :  { %v4628_v0 = vpop.eup %3505  ;;  %v1911_v47 = vmul.f32 %v4625_v13, %v1895_v49 }
 0xf23   :  { %v4633_v61 = vpop.eup %3507  ;;  %v1912_v60 = vmul.f32 %v4628_v0, %v1896_v16 }
 0xf2a   :  { %v4636_v52 = vpop.eup %3509 }
 0xf2b   :  { %v4641_v34 = vpop.eup %3511  ;;  %v1913_v9 = vmul.f32 %v4636_v52, %v1897_v24 }
 0xf2c   :  { %v1915_v19 = vmul.f32 %v4641_v34, %v1899_v30 }
 0xf7a   :  { %v1925_v33 = vpop.permute.xlu1 %1924 }
 0xf7b   :  { %v1948_v23 = vmul.f32 %v4614_v1, %v1925_v33  ;;  %v1927_v29 = vpop.permute.xlu0 %1926  ;;  %v1914_v33 = vmul.f32 %v4633_v61, %v1898_v15 }
 0xf7c   :  { %v1949_v41 = vmul.f32 %v4618_v6, %v1927_v29 }
 0xf7d   :  { %1964 = vrot.lane.b32.xlu1 %v1948_v23, %s3677_s21 }
 0xf7e   :  { %v1929_v37 = vpop.permute.xlu1 %1928  ;;  %1966 = vrot.lane.b32.xlu0 %v1949_v41, %s3677_s21 }
 0xf7f   :  { %v1950_v5 = vmul.f32 %v4620_v36, %v1929_v37  ;;  %v1931_v4 = vpop.permute.xlu0 %1930 }
 0xf80   :  { %v1951_v7 = vmul.f32 %v4625_v13, %v1931_v4 }
 0xf81   :  { %1968 = vrot.lane.b32.xlu1 %v1950_v5, %s3677_s21 }
 0xf82   :  { %v1933_v25 = vpop.permute.xlu1 %1932  ;;  %1970 = vrot.lane.b32.xlu0 %v1951_v7, %s3677_s21 }
 0xf83   :  { %v1952_v20 = vmul.f32 %v4628_v0, %v1933_v25  ;;  %v1937_v26 = vpop.permute.xlu0 %1936 }
 0xf84   :  { %v1954_v54 = vmul.f32 %v4633_v61, %v1937_v26 }
 0xf85   :  { %1972 = vrot.lane.b32.xlu1 %v1952_v20, %s3677_s21 }
 0xf86   :  { %v1935_v45 = vpop.permute.xlu1 %1934  ;;  %1976 = vrot.lane.b32.xlu0 %v1954_v54, %s3677_s21 }
 0xf87   :  { %v1953_v3 = vmul.f32 %v4636_v52, %v1935_v45  ;;  %v1939_v11 = vpop.permute.xlu0 %1938 }
 0xf88   :  { %v1955_v53 = vmul.f32 %v4641_v34, %v1939_v11 }
 0xf89   :  { %1974 = vrot.lane.b32.xlu1 %v1953_v3, %s3677_s21 }
 0xf8a   :  { %1978 = vrot.lane.b32.xlu0 %v1955_v53, %s3677_s21 }
 0xfef   :  { %v1965_v50 = vpop.permute.xlu1 %1964 }
 0xff0   :  { %v4648_v63 = vadd.f32 %v1965_v50, %v1908_v56  ;;  %v1967_v8 = vpop.permute.xlu0 %1966 }
 0xff1   :  { %v4656_v40 = vadd.f32 %v1967_v8, %v1909_v46 }
 0xff2   :  { %3513 = vtanh.f32 %v4648_v63 }
 0xff3   :  { %v1969_v35 = vpop.permute.xlu1 %1968  ;;  %3515 = vtanh.f32 %v4656_v40 }
 0xff4   :  { %v4659_v22 = vadd.f32 %v1969_v35, %v1910_v21  ;;  %v1971_v31 = vpop.permute.xlu0 %1970 }
 0xff5   :  { %v4666_v51 = vadd.f32 %v1971_v31, %v1911_v47 }
 0xff6   :  { %3517 = vtanh.f32 %v4659_v22 }
 0xff7   :  { %v1973_v59 = vpop.permute.xlu1 %1972  ;;  %3519 = vtanh.f32 %v4666_v51 }
 0xff8   :  { %v4670_v38 = vadd.f32 %v1973_v59, %v1912_v60  ;;  %v1977_v2 = vpop.permute.xlu0 %1976 }
 0xff9   :  { %v4677_v23 = vadd.f32 %v1977_v2, %v1914_v33 }
 0xffa   :  { %3521 = vtanh.f32 %v4670_v38 }
 0xffb   :  { %v1975_v10 = vpop.permute.xlu1 %1974  ;;  %3523 = vtanh.f32 %v4677_v23 }
 0xffc   :  { %v3514_v62 = vpop.eup %3513  ;;  %v4679_v39 = vadd.f32 %v1975_v10, %v1913_v9  ;;  %v1979_v44 = vpop.permute.xlu0 %1978 }
 0xffd   :  { %2012 = vrot.lane.b32.xlu1 %v3514_v62, %s3676_s14  ;;  %v3516_v18 = vpop.eup %3515  ;;  %v4684_v29 = vadd.f32 %v1979_v44, %v1915_v19  ;;  %v4752_v19 = vld [vmem:[%s5099_s0 + $0x8] sm:$0xff] }
 0xffe   :  { %3525 = vtanh.f32 %v4679_v39  ;;  %2014 = vrot.lane.b32.xlu0 %v3516_v18, %s3676_s14 }
 0xfff   :  { %3527 = vtanh.f32 %v4684_v29 }
0x1000   :  { %v3518_v41 = vpop.eup %3517 }
0x1001   :  { %2016 = vrot.lane.b32.xlu1 %v3518_v41, %s3676_s14  ;;  %v3520_v58 = vpop.eup %3519  ;;  %v4758_v41 = vld [vmem:[%s5099_s0 + $0x10] sm:$0xff] }
0x1002   :  { %2018 = vrot.lane.b32.xlu0 %v3520_v58, %s3676_s14 }
0x1004   :  { %v3522_v37 = vpop.eup %3521 }
0x1005   :  { %2020 = vrot.lane.b32.xlu1 %v3522_v37, %s3676_s14  ;;  %v3524_v5 = vpop.eup %3523 }
0x1006   :  { %2024 = vrot.lane.b32.xlu0 %v3524_v5, %s3676_s14  ;;  %v4764_v5 = vld [vmem:[%s5099_s0 + $0x18] sm:$0xff] }
0x1008   :  { %v3526_v4 = vpop.eup %3525 }
0x1009   :  { %2022 = vrot.lane.b32.xlu1 %v3526_v4, %s3676_s14  ;;  %v3528_v7 = vpop.eup %3527 }
0x100a   :  { %2026 = vrot.lane.b32.xlu0 %v3528_v7, %s3676_s14 }
0x106f   :  { %v2013_v25 = vpop.permute.xlu1 %2012 }
0x1070   :  { %v2036_v20 = vmul.f32 %v4614_v1, %v2013_v25  ;;  %v2015_v54 = vpop.permute.xlu0 %2014 }
0x1071   :  { %v2037_v45 = vmul.f32 %v4618_v6, %v2015_v54 }
0x1072   :  { %v4697_v26 = vsel %vm2752_vm13, %v4547_v27, %v2036_v20  ;;  %v2052_v3 = vrot.slane %v2036_v20, 5  ;;  %v4770_v20 = vld [vmem:[%s5099_s0 + $0x20] sm:$0xff] }
0x1073   :  { %v2017_v11 = vpop.permute.xlu1 %2016  ;;  %v2053_v48 = vrot.slane %v2037_v45, 4  ;;  %v4703_v56 = vsel %vm2752_vm13, %v4567_v17, %v2037_v45  ;;  %v4777_v45 = vld [vmem:[%s5099_s0 + $0x28] sm:$0xff] }
0x1074   :  { %v2038_v53 = vmul.f32 %v4620_v36, %v2017_v11  ;;  %v2019_v50 = vpop.permute.xlu0 %2018  ;;  %v4783_v11 = vld [vmem:[%s5099_s0 + $0x38] sm:$0xff] }
0x1075   :  { %v2054_v27 = vsel %vm366_vm2, %v2053_v48, %v2052_v3  ;;  %v2039_v42 = vmul.f32 %v4625_v13, %v2019_v50  ;;  %v4789_v48 = vld [vmem:[%s5099_s0 + $0x30] sm:$0xff] }
0x1076   :  { %v2055_v57 = vrot.slane %v2038_v53, 3  ;;  %v4707_v1 = vsel %vm2752_vm13, %v4553_v28, %v2038_v53 }
0x1077   :  { %v2021_v6 = vpop.permute.xlu1 %2020  ;;  %v2057_v8 = vrot.slane %v2039_v42, 2  ;;  %v4715_v17 = vsel %vm2752_vm13, %v4579_v55, %v2039_v42 }
0x1078   :  { %v2056_v46 = vsel %vm369_vm3, %v2055_v57, %v2054_v27  ;;  %v2040_v36 = vmul.f32 %v4628_v0, %v2021_v6  ;;  %v2025_v21 = vpop.permute.xlu0 %2024 }
0x1079   :  { %v2042_v35 = vmul.f32 %v4633_v61, %v2025_v21  ;;  %v2058_v13 = vsel %vm372_vm4, %v2057_v8, %v2056_v46 }
0x107a   :  { %v2059_v49 = vrot.slane %v2040_v36, 1  ;;  %v4719_v28 = vsel %vm2752_vm13, %v4557_v32, %v2040_v36 }
0x107b   :  { %v2023_v16 = vpop.permute.xlu1 %2022  ;;  %v4727_v62 = vsel %vm2752_vm13, %v4574_v12, %v2042_v35  ;;  %v2062_v55 = vrot.slane %v2042_v35, 7 }
0x107c   :  { %v2060_v47 = vsel %vm375_vm5, %v2059_v49, %v2058_v13  ;;  %v2041_v0 = vmul.f32 %v4636_v52, %v2023_v16  ;;  %v2027_v31 = vpop.permute.xlu0 %2026 }
0x107d   :  { %v2043_v61 = vmul.f32 %v4641_v34, %v2027_v31  ;;  %v4746_v34 = vld [vmem:[%s5099_s0] sm:$0xff]  ;;  %s3678_s0 = smov 96  }
0x107e   :  { %v2061_v60 = vsel %vm378_vm6, %v2041_v0, %v2060_v47  ;;  %v4732_v32 = vsel %vm2752_vm13, %v4563_v43, %v2041_v0 }
0x107f   :  { %v2063_v15 = vsel %vm381_vm7, %v2062_v55, %v2061_v60  ;;  %v2064_v59 = vrot.slane %v2043_v61, 6  ;;  %v4738_v52 = vsel %vm2752_vm13, %v4587_v14, %v2043_v61 }
0x1081   :  { %v2065_v12 = vsel %vm384_vm8, %v2064_v59, %v2063_v15 }
0x1082   :  { %2066 = vrot.lane.b32.xlu1 %v2065_v12, %s3677_s21 }
0x10f4   :  { %v2067_v24 = vpop.permute.xlu1 %2066 }
0x10f5   :  { %3078 = vmatmul.mubr.msk.f32.vlgmr.msra.gmra.mrb[6].mxu0 %vm18_vm0, %v2067_v24 }
0x11c8   :  { %v2136_v33 = vpop.f32.mrb[6].mxu0 }
0x11c9   :  { %v2141_v2 = vrot.slane %v2136_v33, 2  ;;  %v3079_v43 = vpop.f32.mrb[7].mxu0  ;;  %v2142_v14 = vrot.slane %v2136_v33, 3  ;;  %v2143_v30 = vrot.slane %v2136_v33, 4  ;;  %v2144_v10 = vrot.slane %v2136_v33, 5 }
0x11ca   :  { %v2145_v18 = vrot.slane %v2136_v33, 6  ;;  %v2146_v37 = vrot.slane %v2136_v33, 7  ;;  %v2147_v25 = vrot.slane %v2136_v33, 1  ;;  %v2162_v50 = vadd.f32 %v4789_v48, %v2136_v33 }
0x11cb   :  { %v2156_v9 = vadd.f32 %v4746_v34, %v2141_v2  ;;  %v2157_v44 = vadd.f32 %v4752_v19, %v2142_v14  ;;  %v2158_v58 = vadd.f32 %v4758_v41, %v2143_v30  ;;  %v2159_v4 = vadd.f32 %v4764_v5, %v2144_v10 }
0x11cc   :  { %v2160_v54 = vadd.f32 %v4770_v20, %v2145_v18  ;;  %v2161_v3 = vadd.f32 %v4777_v45, %v2146_v37  ;;  %v2163_v53 = vadd.f32 %v4783_v11, %v2147_v25  ;;  %v2952_v60 = vmul.f32 -1.442695, %v2162_v50 }
0x11cd   :  { %3529 = vtanh.f32 %v2156_v9  ;;  %v2946_v21 = vmul.f32 -1.442695, %v2156_v9  ;;  %v2947_v49 = vmul.f32 -1.442695, %v2157_v44  ;;  %v2948_v35 = vmul.f32 -1.442695, %v2158_v58 }
0x11ce   :  { %3531 = vtanh.f32 %v2157_v44  ;;  %v2949_v13 = vmul.f32 -1.442695, %v2159_v4  ;;  %v2950_v47 = vmul.f32 -1.442695, %v2160_v54  ;;  %v2951_v0 = vmul.f32 -1.442695, %v2161_v3 }
0x11cf   :  { %3533 = vtanh.f32 %v2158_v58  ;;  %v2953_v31 = vmul.f32 -1.442695, %v2163_v53 }
0x11d0   :  { %3535 = vtanh.f32 %v2159_v4 }
0x11d1   :  { %3537 = vtanh.f32 %v2160_v54 }
0x11d2   :  { %3539 = vtanh.f32 %v2161_v3 }
0x11d3   :  { %3541 = vtanh.f32 %v2163_v53 }
0x11d4   :  { %3543 = vtanh.f32 %v2162_v50 }
0x11d5   :  { %3545 = vpow2.f32 %v2946_v21 }
0x11d6   :  { %3547 = vpow2.f32 %v2947_v49 }
0x11d7   :  { %v3530_v7 = vpop.eup %3529  ;;  %3549 = vpow2.f32 %v2948_v35 }
0x11d8   :  { %2260 = vrot.lane.b32.xlu0 %v3530_v7, %s3676_s14  ;;  %v3532_v57 = vpop.eup %3531  ;;  %3551 = vpow2.f32 %v2949_v13 }
0x11d9   :  { %v3534_v27 = vpop.eup %3533  ;;  %2262 = vrot.lane.b32.xlu1 %v3532_v57, %s3676_s14  ;;  %3553 = vpow2.f32 %v2950_v47 }
0x11da   :  { %v3536_v42 = vpop.eup %3535  ;;  %3555 = vpow2.f32 %v2951_v0 }
0x11db   :  { %v3538_v6 = vpop.eup %3537 }
0x11dc   :  { %2264 = vrot.lane.b32.xlu0 %v3534_v27, %s3676_s14  ;;  %v3540_v46 = vpop.eup %3539 }
0x11dd   :  { %2266 = vrot.lane.b32.xlu1 %v3536_v42, %s3676_s14  ;;  %v3542_v36 = vpop.eup %3541 }
0x11de   :  { %v3544_v8 = vpop.eup %3543 }
0x11df   :  { %v3546_v16 = vpop.eup %3545 }
0x11e0   :  { %2268 = vrot.lane.b32.xlu0 %v3538_v6, %s3676_s14  ;;  %v2188_v55 = vadd.f32 1.0, %v3546_v16  ;;  %v3548_v61 = vpop.eup %3547 }
0x11e1   :  { %2270 = vrot.lane.b32.xlu1 %v3540_v46, %s3676_s14  ;;  %v3550_v15 = vpop.eup %3549  ;;  %v2189_v59 = vadd.f32 1.0, %v3548_v61 }
0x11e2   :  { %3557 = vrcp.f32 %v2188_v55  ;;  %v3552_v12 = vpop.eup %3551  ;;  %v2190_v24 = vadd.f32 1.0, %v3550_v15 }
0x11e3   :  { %3559 = vpow2.f32 %v2953_v31  ;;  %v3554_v33 = vpop.eup %3553  ;;  %v2191_v43 = vadd.f32 1.0, %v3552_v12  ;;  %v2228_v31 = vrot.slane %v4648_v63, 7  ;;  %v2230_v12 = vrot.slane %v4659_v22, 7 }
0x11e4   :  { %2274 = vrot.lane.b32.xlu0 %v3542_v36, %s3676_s14  ;;  %3561 = vpow2.f32 %v2952_v60  ;;  %v3556_v2 = vpop.eup %3555  ;;  %v2192_v30 = vadd.f32 1.0, %v3554_v33 }
0x11e5   :  { %2272 = vrot.lane.b32.xlu1 %v3544_v8, %s3676_s14  ;;  %3563 = vrcp.f32 %v2189_v59  ;;  %v2193_v18 = vadd.f32 1.0, %v3556_v2  ;;  %v2229_v59 = vrot.slane %v4656_v40, 7 }
0x11e6   :  { %3565 = vrcp.f32 %v2190_v24 }
0x11e7   :  { %3567 = vrcp.f32 %v2191_v43  ;;  %v2231_v43 = vrot.slane %v4666_v51, 7 }
0x11e8   :  { %3569 = vrcp.f32 %v2192_v30  ;;  %v2232_v30 = vrot.slane %v4670_v38, 7  ;;  %v2235_v38 = vrot.slane %v4684_v29, 7 }
0x11e9   :  { %3571 = vrcp.f32 %v2193_v18 }
0x11ec   :  { %v4799_v9 = vpop.eup %3557 }
0x11ed   :  { %v3560_v10 = vpop.eup %3559  ;;  %v2244_v60 = vmul.f32 %v4799_v9, %v2228_v31 }
0x11ee   :  { %v3562_v58 = vpop.eup %3561  ;;  %v2195_v37 = vadd.f32 1.0, %v3560_v10 }
0x11ef   :  { %v2194_v4 = vadd.f32 1.0, %v3562_v58  ;;  %v4803_v7 = vpop.eup %3563  ;;  %v2233_v58 = vrot.slane %v4679_v39, 7  ;;  %v2234_v39 = vrot.slane %v4677_v23, 7 }
0x11f0   :  { %3573 = vrcp.f32 %v2195_v37  ;;  %v4805_v54 = vpop.eup %3565  ;;  %v2245_v24 = vmul.f32 %v4803_v7, %v2229_v59 }
0x11f1   :  { %3575 = vrcp.f32 %v2194_v4  ;;  %v4810_v57 = vpop.eup %3567  ;;  %v2246_v2 = vmul.f32 %v4805_v54, %v2230_v12 }
0x11f2   :  { %v4813_v42 = vpop.eup %3569  ;;  %v2247_v40 = vmul.f32 %v4810_v57, %v2231_v43 }
0x11f3   :  { %v4818_v8 = vpop.eup %3571  ;;  %v2248_v18 = vmul.f32 %v4813_v42, %v2232_v30 }
0x11fa   :  { %v4821_v49 = vpop.eup %3573 }
0x11fb   :  { %v4826_v47 = vpop.eup %3575 }
0x11fc   :  { %v2250_v29 = vmul.f32 %v4826_v47, %v2234_v39 }
0x124a   :  { %v2261_v14 = vpop.permute.xlu0 %2260 }
0x124b   :  { %v2284_v44 = vmul.f32 %v4799_v9, %v2261_v14  ;;  %v2263_v25 = vpop.permute.xlu1 %2262 }
0x124c   :  { %v2285_v3 = vmul.f32 %v4803_v7, %v2263_v25  ;;  %v2249_v25 = vmul.f32 %v4818_v8, %v2233_v58 }
0x124d   :  { %2300 = vrot.lane.b32.xlu0 %v2284_v44, %s3677_s21 }
0x124e   :  { %v2265_v53 = vpop.permute.xlu0 %2264  ;;  %2302 = vrot.lane.b32.xlu1 %v2285_v3, %s3677_s21 }
0x124f   :  { %v2286_v50 = vmul.f32 %v4805_v54, %v2265_v53  ;;  %v2267_v27 = vpop.permute.xlu1 %2266  ;;  %v2251_v53 = vmul.f32 %v4821_v49, %v2235_v38 }
0x1250   :  { %v2287_v6 = vmul.f32 %v4810_v57, %v2267_v27 }
0x1251   :  { %2304 = vrot.lane.b32.xlu0 %v2286_v50, %s3677_s21 }
0x1252   :  { %v2269_v46 = vpop.permute.xlu0 %2268  ;;  %2306 = vrot.lane.b32.xlu1 %v2287_v6, %s3677_s21 }
0x1253   :  { %v2288_v36 = vmul.f32 %v4813_v42, %v2269_v46  ;;  %v2271_v21 = vpop.permute.xlu1 %2270 }
0x1254   :  { %v2289_v35 = vmul.f32 %v4818_v8, %v2271_v21 }
0x1255   :  { %2308 = vrot.lane.b32.xlu0 %v2288_v36, %s3677_s21 }
0x1256   :  { %v2275_v13 = vpop.permute.xlu0 %2274  ;;  %2310 = vrot.lane.b32.xlu1 %v2289_v35, %s3677_s21 }
0x1257   :  { %v2291_v16 = vmul.f32 %v4821_v49, %v2275_v13  ;;  %v2273_v0 = vpop.permute.xlu1 %2272 }
0x1258   :  { %v2290_v55 = vmul.f32 %v4826_v47, %v2273_v0 }
0x1259   :  { %2314 = vrot.lane.b32.xlu0 %v2291_v16, %s3677_s21 }
0x125a   :  { %2312 = vrot.lane.b32.xlu1 %v2290_v55, %s3677_s21 }
0x12bf   :  { %v2301_v61 = vpop.permute.xlu0 %2300 }
0x12c0   :  { %v4833_v15 = vadd.f32 %v2301_v61, %v2244_v60  ;;  %v2303_v33 = vpop.permute.xlu1 %2302 }
0x12c1   :  { %v4841_v14 = vadd.f32 %v2303_v33, %v2245_v24 }
0x12c2   :  { %3577 = vtanh.f32 %v4833_v15 }
0x12c3   :  { %v2305_v63 = vpop.permute.xlu0 %2304  ;;  %3579 = vtanh.f32 %v4841_v14 }
0x12c4   :  { %v4844_v10 = vadd.f32 %v2305_v63, %v2246_v2  ;;  %v2307_v22 = vpop.permute.xlu1 %2306 }
0x12c5   :  { %v4851_v51 = vadd.f32 %v2307_v22, %v2247_v40 }
0x12c6   :  { %3581 = vtanh.f32 %v4844_v10 }
0x12c7   :  { %v2309_v37 = vpop.permute.xlu0 %2308  ;;  %3583 = vtanh.f32 %v4851_v51 }
0x12c8   :  { %v4855_v4 = vadd.f32 %v2309_v37, %v2248_v18  ;;  %v2311_v3 = vpop.permute.xlu1 %2310 }
0x12c9   :  { %v4862_v50 = vadd.f32 %v2311_v3, %v2249_v25 }
0x12ca   :  { %3585 = vtanh.f32 %v4855_v4 }
0x12cb   :  { %v2315_v27 = vpop.permute.xlu0 %2314  ;;  %3587 = vtanh.f32 %v4862_v50 }
0x12cc   :  { %v3578_v44 = vpop.eup %3577  ;;  %v4864_v6 = vadd.f32 %v2315_v27, %v2251_v53  ;;  %v2313_v46 = vpop.permute.xlu1 %2312 }
0x12cd   :  { %2348 = vrot.lane.b32.xlu0 %v3578_v44, %s3676_s14  ;;  %v3580_v36 = vpop.eup %3579  ;;  %v4869_v21 = vadd.f32 %v2313_v46, %v2250_v29 }
0x12ce   :  { %3589 = vtanh.f32 %v4864_v6  ;;  %2350 = vrot.lane.b32.xlu1 %v3580_v36, %s3676_s14 }
0x12cf   :  { %3591 = vtanh.f32 %v4869_v21 }
0x12d0   :  { %v3582_v35 = vpop.eup %3581 }
0x12d1   :  { %2352 = vrot.lane.b32.xlu0 %v3582_v35, %s3676_s14  ;;  %v3584_v23 = vpop.eup %3583 }
0x12d2   :  { %2354 = vrot.lane.b32.xlu1 %v3584_v23, %s3676_s14 }
0x12d4   :  { %v3586_v13 = vpop.eup %3585 }
0x12d5   :  { %2356 = vrot.lane.b32.xlu0 %v3586_v13, %s3676_s14  ;;  %v3588_v16 = vpop.eup %3587 }
0x12d6   :  { %2358 = vrot.lane.b32.xlu1 %v3588_v16, %s3676_s14 }
0x12d8   :  { %v3590_v0 = vpop.eup %3589 }
0x12d9   :  { %2362 = vrot.lane.b32.xlu0 %v3590_v0, %s3676_s14  ;;  %v3592_v55 = vpop.eup %3591 }
0x12da   :  { %2360 = vrot.lane.b32.xlu1 %v3592_v55, %s3676_s14 }
0x133f   :  { %v2349_v31 = vpop.permute.xlu0 %2348 }
0x1340   :  { %v2372_v60 = vmul.f32 %v4799_v9, %v2349_v31  ;;  %v2351_v59 = vpop.permute.xlu1 %2350 }
0x1341   :  { %v2373_v12 = vmul.f32 %v4803_v7, %v2351_v59 }
0x1342   :  { %v4882_v61 = vsel %vm2761_vm14, %v4697_v26, %v2372_v60  ;;  %v2388_v24 = vrot.slane %v2372_v60, 6 }
0x1343   :  { %v2353_v33 = vpop.permute.xlu0 %2352  ;;  %v2389_v43 = vrot.slane %v2373_v12, 5  ;;  %v4888_v63 = vsel %vm2761_vm14, %v4703_v56, %v2373_v12 }
0x1344   :  { %v2374_v2 = vmul.f32 %v4805_v54, %v2353_v33  ;;  %v2355_v30 = vpop.permute.xlu1 %2354 }
0x1345   :  { %v2390_v26 = vsel %vm366_vm2, %v2389_v43, %v2388_v24  ;;  %v2375_v44 = vmul.f32 %v4810_v57, %v2355_v30 }
0x1346   :  { %v2391_v40 = vrot.slane %v2374_v2, 4  ;;  %v4892_v9 = vsel %vm2761_vm14, %v4707_v1, %v2374_v2 }
0x1347   :  { %v2357_v7 = vpop.permute.xlu0 %2356  ;;  %v2393_v18 = vrot.slane %v2375_v44, 3  ;;  %v4900_v56 = vsel %vm2761_vm14, %v4715_v17, %v2375_v44 }
0x1348   :  { %v2392_v22 = vsel %vm369_vm3, %v2391_v40, %v2390_v26  ;;  %v2376_v54 = vmul.f32 %v4813_v42, %v2357_v7  ;;  %v2359_v58 = vpop.permute.xlu1 %2358 }
0x1349   :  { %v2377_v38 = vmul.f32 %v4818_v8, %v2359_v58  ;;  %v2394_v57 = vsel %vm372_vm4, %v2393_v18, %v2392_v22 }
0x134a   :  { %v2395_v37 = vrot.slane %v2376_v54, 2  ;;  %v4904_v1 = vsel %vm2761_vm14, %v4719_v28, %v2376_v54 }
0x134b   :  { %v2363_v25 = vpop.permute.xlu0 %2362  ;;  %v2397_v53 = vrot.slane %v2377_v38, 1  ;;  %v4912_v17 = vsel %vm2761_vm14, %v4732_v32, %v2377_v38 }
0x134c   :  { %v2396_v3 = vsel %vm375_vm5, %v2395_v37, %v2394_v57  ;;  %v2379_v42 = vmul.f32 %v4821_v49, %v2363_v25  ;;  %v2361_v39 = vpop.permute.xlu1 %2360 }
0x134d   :  { %v2378_v8 = vmul.f32 %v4826_v47, %v2361_v39  ;;  %v2398_v29 = vsel %vm378_vm6, %v2397_v53, %v2396_v3 }
0x134e   :  { %v2400_v27 = vrot.slane %v2379_v42, 7  ;;  %v4916_v28 = vsel %vm2761_vm14, %v4738_v52, %v2379_v42 }
0x134f   :  { %v2399_v46 = vsel %vm381_vm7, %v2378_v8, %v2398_v29  ;;  %v4923_v49 = vsel %vm2761_vm14, %v4727_v62, %v2378_v8 }
0x1350   :  { %v2401_v36 = vsel %vm384_vm8, %v2400_v27, %v2399_v46 }
0x1351   :  { %2402 = vrot.lane.b32.xlu0 %v2401_v36, %s3677_s21 }
0x13c3   :  { %v2403_v32 = vpop.permute.xlu0 %2402 }
0x13c4   :  { %3089 = vmatmul.mubr.msk.f32.vlgmr.msra.gmra.mrb[6].mxu1 %vm18_vm0, %v2403_v32 }
0x1497   :  { %v2472_v35 = vpop.f32.mrb[6].mxu1 }
0x1498   :  { %v3090_v52 = vpop.f32.mrb[7].mxu1  ;;  %v2478_v23 = vrot.slane %v2472_v35, 2  ;;  %v2479_v13 = vrot.slane %v2472_v35, 3  ;;  %v2480_v47 = vrot.slane %v2472_v35, 4  ;;  %v2481_v0 = vrot.slane %v2472_v35, 5 }
0x1499   :  { %v2482_v31 = vrot.slane %v2472_v35, 6  ;;  %v2483_v60 = vrot.slane %v2472_v35, 7  ;;  %v2477_v24 = vrot.slane %v2472_v35, 1 }
0x149a   :  { %v2493_v16 = vadd.f32 %v4752_v19, %v2478_v23  ;;  %v2494_v55 = vadd.f32 %v4758_v41, %v2479_v13  ;;  %v2495_v62 = vadd.f32 %v4764_v5, %v2480_v47  ;;  %v2496_v59 = vadd.f32 %v4770_v20, %v2481_v0 }
0x149b   :  { %v2497_v12 = vadd.f32 %v4777_v45, %v2482_v31  ;;  %v2498_v33 = vadd.f32 %v4789_v48, %v2483_v60  ;;  %v2499_v19 = vadd.f32 %v4783_v11, %v2472_v35  ;;  %v2492_v41 = vadd.f32 %v4746_v34, %v2477_v24 }
0x149c   :  { %3593 = vtanh.f32 %v2493_v16  ;;  %v2956_v30 = vmul.f32 -1.442695, %v2493_v16  ;;  %v2957_v40 = vmul.f32 -1.442695, %v2494_v55  ;;  %v2958_v26 = vmul.f32 -1.442695, %v2495_v62 }
0x149d   :  { %3595 = vtanh.f32 %v2494_v55  ;;  %v2959_v44 = vmul.f32 -1.442695, %v2496_v59  ;;  %v2960_v7 = vmul.f32 -1.442695, %v2497_v12  ;;  %v2961_v22 = vmul.f32 -1.442695, %v2498_v33 }
0x149e   :  { %3597 = vtanh.f32 %v2495_v62  ;;  %v2962_v54 = vmul.f32 -1.442695, %v2499_v19  ;;  %v2955_v18 = vmul.f32 -1.442695, %v2492_v41 }
0x149f   :  { %3599 = vtanh.f32 %v2496_v59 }
0x14a0   :  { %3601 = vtanh.f32 %v2497_v12 }
0x14a1   :  { %3603 = vtanh.f32 %v2498_v33 }
0x14a2   :  { %3605 = vtanh.f32 %v2499_v19 }
0x14a3   :  { %3607 = vtanh.f32 %v2492_v41 }
0x14a4   :  { %3609 = vpow2.f32 %v2956_v30  ;;  %v2565_v30 = vrot.slane %v4841_v14, 7 }
0x14a5   :  { %3611 = vpow2.f32 %v2957_v40  ;;  %v2566_v40 = vrot.slane %v4844_v10, 7 }
0x14a6   :  { %v3594_v2 = vpop.eup %3593  ;;  %3613 = vpow2.f32 %v2958_v26 }
0x14a7   :  { %v3596_v5 = vpop.eup %3595  ;;  %2598 = vrot.lane.b32.xlu1 %v3594_v2, %s3676_s14  ;;  %3615 = vpow2.f32 %v2959_v44 }
0x14a8   :  { %2600 = vrot.lane.b32.xlu0 %v3596_v5, %s3676_s14  ;;  %v3598_v20 = vpop.eup %3597  ;;  %3617 = vpow2.f32 %v2960_v7 }
0x14a9   :  { %v3600_v45 = vpop.eup %3599  ;;  %3619 = vpow2.f32 %v2961_v22  ;;  %v2567_v22 = vrot.slane %v4851_v51, 7  ;;  %v2570_v51 = vrot.slane %v4869_v21, 7  ;;  %v2564_v21 = vrot.slane %v4833_v15, 7 }
0x14aa   :  { %v3602_v48 = vpop.eup %3601  ;;  %3621 = vpow2.f32 %v2962_v54 }
0x14ab   :  { %2602 = vrot.lane.b32.xlu1 %v3598_v20, %s3676_s14  ;;  %v3604_v11 = vpop.eup %3603  ;;  %3623 = vpow2.f32 %v2955_v18 }
0x14ac   :  { %2604 = vrot.lane.b32.xlu0 %v3600_v45, %s3676_s14  ;;  %v3606_v34 = vpop.eup %3605 }
0x14ad   :  { %v3608_v43 = vpop.eup %3607 }
0x14ae   :  { %v3610_v58 = vpop.eup %3609 }
0x14af   :  { %2606 = vrot.lane.b32.xlu1 %v3602_v48, %s3676_s14  ;;  %v3612_v37 = vpop.eup %3611  ;;  %v2525_v38 = vadd.f32 1.0, %v3610_v58  ;;  %v2568_v58 = vrot.slane %v4855_v4, 7 }
0x14b0   :  { %2608 = vrot.lane.b32.xlu0 %v3604_v11, %s3676_s14  ;;  %v3614_v57 = vpop.eup %3613  ;;  %v2526_v25 = vadd.f32 1.0, %v3612_v37 }
0x14b1   :  { %v3616_v3 = vpop.eup %3615  ;;  %3625 = vrcp.f32 %v2525_v38  ;;  %v2527_v42 = vadd.f32 1.0, %v3614_v57 }
0x14b2   :  { %v3618_v53 = vpop.eup %3617  ;;  %3627 = vrcp.f32 %v2526_v25  ;;  %v2528_v39 = vadd.f32 1.0, %v3616_v3  ;;  %v2569_v3 = vrot.slane %v4862_v50, 7 }
0x14b3   :  { %2610 = vrot.lane.b32.xlu1 %v3606_v34, %s3676_s14  ;;  %v3620_v27 = vpop.eup %3619  ;;  %3629 = vrcp.f32 %v2527_v42  ;;  %v2529_v8 = vadd.f32 1.0, %v3618_v53 }
0x14b4   :  { %2596 = vrot.lane.b32.xlu0 %v3608_v43, %s3676_s14  ;;  %v3622_v29 = vpop.eup %3621  ;;  %3631 = vrcp.f32 %v2528_v39  ;;  %v2530_v46 = vadd.f32 1.0, %v3620_v27 }
0x14b5   :  { %v3624_v36 = vpop.eup %3623  ;;  %v2531_v32 = vadd.f32 1.0, %v3622_v29  ;;  %3633 = vrcp.f32 %v2529_v8 }
0x14b6   :  { %3635 = vrcp.f32 %v2530_v46  ;;  %v2524_v35 = vadd.f32 1.0, %v3624_v36 }
0x14b7   :  { %3637 = vrcp.f32 %v2531_v32  ;;  %v2571_v32 = vrot.slane %v4864_v6, 7 }
0x14b8   :  { %3639 = vrcp.f32 %v2524_v35 }
0x14bb   :  { %v4944_v52 = vpop.eup %3625 }
0x14bc   :  { %v4946_v13 = vpop.eup %3627  ;;  %v2581_v26 = vmul.f32 %v4944_v52, %v2565_v30 }
0x14bd   :  { %v4951_v55 = vpop.eup %3629  ;;  %v2582_v7 = vmul.f32 %v4946_v13, %v2566_v40 }
0x14be   :  { %v4954_v62 = vpop.eup %3631  ;;  %v2583_v57 = vmul.f32 %v4951_v55, %v2567_v22 }
0x14bf   :  { %v4959_v24 = vpop.eup %3633  ;;  %v2584_v10 = vmul.f32 %v4954_v62, %v2568_v58 }
0x14c0   :  { %v4962_v19 = vpop.eup %3635  ;;  %v2585_v8 = vmul.f32 %v4959_v24, %v2569_v3 }
0x14c1   :  { %v4967_v20 = vpop.eup %3637  ;;  %v2586_v36 = vmul.f32 %v4962_v19, %v2570_v51 }
0x14c2   :  { %v4970_v48 = vpop.eup %3639 }
0x1519   :  { %v2599_v23 = vpop.permute.xlu1 %2598 }
0x151a   :  { %v2601_v47 = vpop.permute.xlu0 %2600  ;;  %v2621_v16 = vmul.f32 %v4944_v52, %v2599_v23 }
0x151b   :  { %v2622_v0 = vmul.f32 %v4946_v13, %v2601_v47 }
0x151c   :  { %2638 = vrot.lane.b32.xlu1 %v2621_v16, %s3677_s21 }
0x151d   :  { %2640 = vrot.lane.b32.xlu0 %v2622_v0, %s3677_s21  ;;  %v2603_v31 = vpop.permute.xlu1 %2602 }
0x151e   :  { %v2605_v60 = vpop.permute.xlu0 %2604  ;;  %v2623_v59 = vmul.f32 %v4951_v55, %v2603_v31  ;;  %v2587_v31 = vmul.f32 %v4967_v20, %v2571_v32 }
0x151f   :  { %v2624_v12 = vmul.f32 %v4954_v62, %v2605_v60 }
0x1520   :  { %2642 = vrot.lane.b32.xlu1 %v2623_v59, %s3677_s21 }
0x1521   :  { %2644 = vrot.lane.b32.xlu0 %v2624_v12, %s3677_s21  ;;  %v2607_v33 = vpop.permute.xlu1 %2606  ;;  %v2580_v12 = vmul.f32 %v4970_v48, %v2564_v21 }
0x1522   :  { %v2609_v41 = vpop.permute.xlu0 %2608  ;;  %v2625_v2 = vmul.f32 %v4959_v24, %v2607_v33 }
0x1523   :  { %v2626_v5 = vmul.f32 %v4962_v19, %v2609_v41 }
0x1524   :  { %2646 = vrot.lane.b32.xlu1 %v2625_v2, %s3677_s21 }
0x1525   :  { %2648 = vrot.lane.b32.xlu0 %v2626_v5, %s3677_s21  ;;  %v2611_v45 = vpop.permute.xlu1 %2610 }
0x1526   :  { %v2627_v11 = vmul.f32 %v4967_v20, %v2611_v45  ;;  %v2597_v34 = vpop.permute.xlu0 %2596 }
0x1527   :  { %v2620_v43 = vmul.f32 %v4970_v48, %v2597_v34 }
0x1528   :  { %2650 = vrot.lane.b32.xlu1 %v2627_v11, %s3677_s21 }
0x1529   :  { %2636 = vrot.lane.b32.xlu0 %v2620_v43, %s3677_s21 }
0x158e   :  { %v2639_v44 = vpop.permute.xlu1 %2638 }
0x158f   :  { %v2661_v54 = vadd.f32 %v2639_v44, %v2581_v26  ;;  %v2641_v18 = vpop.permute.xlu0 %2640 }
0x1590   :  { %v2662_v37 = vadd.f32 %v2641_v18, %v2582_v7 }
0x1591   :  { %3641 = vtanh.f32 %v2661_v54  ;;  %v2858_v38 = vrot.slane %v2661_v54, 7 }
0x1592   :  { %3643 = vtanh.f32 %v2662_v37  ;;  %v2859_v14 = vrot.slane %v2662_v37, 6  ;;  %v2643_v25 = vpop.permute.xlu1 %2642 }
0x1593   :  { %v2663_v42 = vadd.f32 %v2643_v25, %v2583_v57  ;;  %v2645_v53 = vpop.permute.xlu0 %2644 }
0x1594   :  { %v2860_v39 = vsel %vm366_vm2, %v2859_v14, %v2858_v38  ;;  %v2664_v27 = vadd.f32 %v2645_v53, %v2584_v10 }
0x1595   :  { %3645 = vtanh.f32 %v2663_v42  ;;  %v2861_v4 = vrot.slane %v2663_v42, 5 }
0x1596   :  { %3647 = vtanh.f32 %v2664_v27  ;;  %v2863_v29 = vrot.slane %v2664_v27, 4  ;;  %v2647_v46 = vpop.permute.xlu1 %2646 }
0x1597   :  { %v2862_v50 = vsel %vm369_vm3, %v2861_v4, %v2860_v39  ;;  %v2665_v35 = vadd.f32 %v2647_v46, %v2585_v8  ;;  %v2649_v23 = vpop.permute.xlu0 %2648 }
0x1598   :  { %v2864_v47 = vsel %vm372_vm4, %v2863_v29, %v2862_v50  ;;  %v2666_v16 = vadd.f32 %v2649_v23, %v2586_v36 }
0x1599   :  { %3649 = vtanh.f32 %v2665_v35  ;;  %v2865_v0 = vrot.slane %v2665_v35, 3 }
0x159a   :  { %3651 = vtanh.f32 %v2666_v16  ;;  %v2867_v60 = vrot.slane %v2666_v16, 2  ;;  %v2651_v59 = vpop.permute.xlu1 %2650 }
0x159b   :  { %v3642_v33 = vpop.eup %3641  ;;  %v2866_v6 = vsel %vm375_vm5, %v2865_v0, %v2864_v47  ;;  %v2667_v41 = vadd.f32 %v2651_v59, %v2587_v31  ;;  %v2637_v2 = vpop.permute.xlu0 %2636 }
0x159c   :  { %v3644_v5 = vpop.eup %3643  ;;  %v4996_v45 = vadd.f32 %v2637_v2, %v2580_v12  ;;  %2686 = vrot.lane.b32.xlu1 %v3642_v33, %s3676_s14  ;;  %v2868_v15 = vsel %vm378_vm6, %v2867_v60, %v2866_v6 }
0x159d   :  { %3653 = vtanh.f32 %v2667_v41  ;;  %v2869_v11 = vrot.slane %v2667_v41, 1  ;;  %2688 = vrot.lane.b32.xlu0 %v3644_v5, %s3676_s14 }
0x159e   :  { %3655 = vtanh.f32 %v4996_v45 }
0x159f   :  { %v3646_v34 = vpop.eup %3645  ;;  %v2870_v43 = vsel %vm381_vm7, %v2869_v11, %v2868_v15 }
0x15a0   :  { %v3648_v30 = vpop.eup %3647  ;;  %2690 = vrot.lane.b32.xlu1 %v3646_v34, %s3676_s14 }
0x15a1   :  { %2692 = vrot.lane.b32.xlu0 %v3648_v30, %s3676_s14 }
0x15a3   :  { %v3650_v40 = vpop.eup %3649 }
0x15a4   :  { %v3652_v26 = vpop.eup %3651  ;;  %2694 = vrot.lane.b32.xlu1 %v3650_v40, %s3676_s14 }
0x15a5   :  { %2696 = vrot.lane.b32.xlu0 %v3652_v26, %s3676_s14 }
0x15a7   :  { %v3654_v44 = vpop.eup %3653 }
0x15a8   :  { %v3656_v7 = vpop.eup %3655  ;;  %2698 = vrot.lane.b32.xlu1 %v3654_v44, %s3676_s14 }
0x15a9   :  { %2684 = vrot.lane.b32.xlu0 %v3656_v7, %s3676_s14 }
0x160e   :  { %v2687_v22 = vpop.permute.xlu1 %2686 }
0x160f   :  { %v2689_v54 = vpop.permute.xlu0 %2688  ;;  %v2709_v10 = vmul.f32 %v4944_v52, %v2687_v22 }
0x1610   :  { %v2710_v3 = vmul.f32 %v4946_v13, %v2689_v54 }
0x1611   :  { %v2827_v39 = vrot.slane %v2709_v10, 7 }
0x1612   :  { %v2691_v18 = vpop.permute.xlu1 %2690  ;;  %v2828_v27 = vrot.slane %v2710_v3, 6 }
0x1613   :  { %v2693_v58 = vpop.permute.xlu0 %2692  ;;  %v2711_v53 = vmul.f32 %v4951_v55, %v2691_v18  ;;  %v2772_v55 = vsel %vm2770_vm15, %v4888_v63, %v2709_v10 }
0x1615   :  { %v2830_v4 = vrot.slane %v2711_v53, 5 }
0x1616   :  { %v2695_v37 = vpop.permute.xlu1 %2694 }
0x1617   :  { %v2697_v38 = vpop.permute.xlu0 %2696  ;;  %v2713_v52 = vmul.f32 %v4959_v24, %v2695_v37  ;;  %v2773_v24 = vsel %vm2770_vm15, %v4892_v9, %v2710_v3 }
0x1618   :  { %v2714_v8 = vmul.f32 %v4962_v19, %v2697_v38 }
0x1619   :  { %v2834_v29 = vrot.slane %v2713_v52, 3  ;;  %v2776_v50 = vsel %vm2770_vm15, %v4912_v17, %v2713_v52 }
0x161a   :  { %v2699_v57 = vpop.permute.xlu1 %2698  ;;  %v2836_v46 = vrot.slane %v2714_v8, 2 }
0x161b   :  { %v2715_v14 = vmul.f32 %v4967_v20, %v2699_v57  ;;  %v2685_v25 = vpop.permute.xlu0 %2684  ;;  %v2712_v20 = vmul.f32 %v4954_v62, %v2693_v58 }
0x161c   :  { %v2708_v42 = vmul.f32 %v4970_v48, %v2685_v25 }
0x161d   :  { %v2778_v51 = vsel %vm2770_vm15, %v4916_v28, %v2715_v14  ;;  %v2829_v28 = vsel %vm366_vm2, %v2828_v27, %v2827_v39  ;;  %v2832_v48 = vrot.slane %v2712_v20, 4  ;;  %v2838_v32 = vrot.slane %v2715_v14, 1 }
0x161e   :  { %2840 = vrot.lane.b32.xlu1 %v2708_v42, %s3677_s21  ;;  %2801 = vrot.lane.b32.xlu0 %v2778_v51, %s3677_s21  ;;  %v2771_v13 = vsel %vm2770_vm15, %v4882_v61, %v2708_v42  ;;  %v2831_v62 = vsel %vm369_vm3, %v2830_v4, %v2829_v28  ;;  %v2774_v61 = vsel %vm2770_vm15, %v4900_v56, %v2711_v53  ;;  %vm2848_vm2 = vcmask 260096  }
0x161f   :  { %v2833_v63 = vsel %vm372_vm4, %v2832_v48, %v2831_v62  ;;  %v2775_v19 = vsel %vm2770_vm15, %v4904_v1, %v2712_v20  ;;  %v2777_v56 = vsel %vm2770_vm15, %v4923_v49, %v2714_v8 }
0x1620   :  { %v2835_v36 = vsel %vm375_vm5, %v2834_v29, %v2833_v63 }
0x1621   :  { %v2837_v9 = vsel %vm378_vm6, %v2836_v46, %v2835_v36 }
0x1622   :  { %2787 = vrot.lane.b32.xlu1 %v2771_v13, %s3677_s21  ;;  %2789 = vrot.lane.b32.xlu0 %v2772_v55, %s3677_s21  ;;  %v2839_v35 = vsel %vm381_vm7, %v2838_v32, %v2837_v9 }
0x1626   :  { %2791 = vrot.lane.b32.xlu1 %v2773_v24, %s3677_s21  ;;  %2793 = vrot.lane.b32.xlu0 %v2774_v61, %s3677_s21 }
0x162a   :  { %2795 = vrot.lane.b32.xlu1 %v2775_v19, %s3677_s21  ;;  %2797 = vrot.lane.b32.xlu0 %v2776_v50, %s3677_s21 }
0x162e   :  { %2799 = vrot.lane.b32.xlu1 %v2777_v56, %s3677_s21  ;;  %2842 = vrot.lane.b32.xlu0 %v2839_v35, %s3677_s21 }
0x1632   :  { %2871 = vrot.lane.b32.xlu1 %v4996_v45, %s3678_s0  ;;  %2873 = vrot.lane.b32.xlu0 %v2870_v43, %s3678_s0 }
0x1690   :  { %v2841_v1 = vpop.permute.xlu1 %2840  ;;  %v2802_v17 = vpop.permute.xlu0 %2801 }
0x1691   :  { %2847 = vst.msk [vmem:[%s5097_s3 - $0x7] sm:$0x80] %vm2846_vm1, %v2841_v1 }
0x1692   :  { %2818 = vst.msk [vmem:[%s5100_s2 + $0x38] sm:$0xff] %vm18_vm0, %v2802_v17 }
0x1694   :  { %v2788_v49 = vpop.permute.xlu1 %2787  ;;  %v2790_v23 = vpop.permute.xlu0 %2789 }
0x1695   :  { %2811 = vst.msk [vmem:[%s5100_s2] sm:$0xff] %vm18_vm0, %v2788_v49  ;;  %2812 = vst.msk [vmem:[%s5100_s2 + $0x8] sm:$0xff] %vm18_vm0, %v2790_v23 }
0x1698   :  { %v2792_v21 = vpop.permute.xlu1 %2791  ;;  %v2794_v47 = vpop.permute.xlu0 %2793 }
0x1699   :  { %2813 = vst.msk [vmem:[%s5100_s2 + $0x10] sm:$0xff] %vm18_vm0, %v2792_v21  ;;  %2814 = vst.msk [vmem:[%s5100_s2 + $0x18] sm:$0xff] %vm18_vm0, %v2794_v47 }
0x169c   :  { %v2796_v16 = vpop.permute.xlu1 %2795  ;;  %v2798_v0 = vpop.permute.xlu0 %2797 }
0x169d   :  { %2815 = vst.msk [vmem:[%s5100_s2 + $0x20] sm:$0xff] %vm18_vm0, %v2796_v16  ;;  %2816 = vst.msk [vmem:[%s5100_s2 + $0x28] sm:$0xff] %vm18_vm0, %v2798_v0 }
0x16a0   :  { %v2800_v31 = vpop.permute.xlu1 %2799  ;;  %v2843_v60 = vpop.permute.xlu0 %2842 }
0x16a1   :  { %2817 = vst.msk [vmem:[%s5100_s2 + $0x30] sm:$0xff] %vm18_vm0, %v2800_v31 }
0x16a2   :  { %2849 = vst.msk [vmem:[%s5097_s3 + $0x1] sm:$0x7f] %vm2848_vm2, %v2843_v60 }
0x16a4   :  { %v2872_v59 = vpop.permute.xlu1 %2871  ;;  %v2874_v12 = vpop.permute.xlu0 %2873 }
0x16a5   :  { %2877 = vst.msk [vmem:[%s5098_s4 - $0x7] sm:$0x80] %vm2846_vm1, %v2872_v59 }
0x16a6   :  { %2878 = vst.msk [vmem:[%s5098_s4 + $0x1] sm:$0x7f] %vm2848_vm2, %v2874_v12 }

</bundles_post_ra>
